<compile_context>
chip_gen: v5e
topology: v5e:2x2
jax: 0.10.0
libtpu: 0.0.40
codegen_flags: <defaults>
</compile_context>

<pallas_src>
import functools

import jax
import jax.numpy as jnp
from jax import lax
from jax.experimental import pallas as pl
from jax.experimental.pallas import tpu as pltpu


# ----------------------------------------------------------------------------
# Single fused decoder kernel: one grid step == one batch element.
# All tensors inside are channels-first (channels, spatial); spatial on lanes.
# ----------------------------------------------------------------------------
def _decoder_kernel(
        z_ref,                                                  # (m*c, w*h)
        wf1a_ref, bf1a_ref, wf1b_ref, bf1b_ref,                 # fusion block 1 (kron-expanded)
        wf2a_ref, bf2a_ref, wf2b_ref, bf2b_ref,                 # fusion block 2 (kron-expanded)
        wdq_ref, bdq_ref, wdk_ref, bdk_ref, wdv_ref, bdv_ref, gd_ref,   # d_attention
        wsq_ref, bsq_ref, wsk_ref, bsk_ref, wsv_ref, bsv_ref, gs_ref,   # s_attention
        o_ref,                                                  # (n, c, w*h)
        yd_s, xs_s, ys_s,                                       # VMEM scratch
        *, n, c, wh):
    f32 = jnp.float32

    def pconv(w_ref, b_ref, x):
        # pointwise Conv3d + ReLU on a channels-first token matrix.
        y = jnp.dot(w_ref[...], x, preferred_element_type=f32) + b_ref[...]
        return jnp.maximum(y, 0.0)

    def mab(x, wq_ref, bq_ref, wk_ref, bk_ref, wv_ref, bv_ref, gamma, scale):
        # x: (C, N) -- spatial self-attention over the N (lane) axis.
        q = jnp.dot(wq_ref[...], x, preferred_element_type=f32) + bq_ref[...]
        k = jnp.dot(wk_ref[...], x, preferred_element_type=f32) + bk_ref[...]
        v = jnp.dot(wv_ref[...], x, preferred_element_type=f32) + bv_ref[...]
        qt = (q * scale).T                                   # (N, C); scale folded into q
        s = jnp.dot(qt, k, preferred_element_type=f32)       # (N, N)
        s = s - jnp.max(s, axis=-1, keepdims=True)
        p = jnp.exp(s)
        inv = pl.reciprocal(jnp.sum(p, axis=-1, keepdims=True), approx=True)
        attn = p * inv
        # out[ch, i] = sum_j v[ch, j] * attn[i, j]  (NT matmul, no score transpose)
        out = lax.dot_general(v, attn, (((1,), (1,)), ((), ())),
                              preferred_element_type=f32)     # (C, N)
        return x + gamma * out

    # ---- fusion: 2x BottleneckLayer3D == 4x (pointwise Conv3d + ReLU) -------
    x = z_ref[...].astype(f32)                 # (m*c, wh)
    x = pconv(wf1a_ref, bf1a_ref, x)           # (n*c, wh)
    x = pconv(wf1b_ref, bf1b_ref, x)
    x = pconv(wf2a_ref, bf2a_ref, x)
    x = pconv(wf2b_ref, bf2b_ref, x)           # (n*c, wh) == dynamics layout

    # ---- d_attention: channels = n*c, tokens = w*h --------------------------
    yd_s[...] = mab(x, wdq_ref, bdq_ref, wdk_ref, bdk_ref, wdv_ref, bdv_ref,
                    gd_ref[0, 0], 1.0 / float(n * c) ** 0.5)

    # ---- _reshape_for_semantics(forward): (n*c, wh) -> (c, n*wh) ------------
    for i in range(n):
        xs_s[:, i * wh:(i + 1) * wh] = yd_s[i * c:(i + 1) * c, :]

    # ---- s_attention: channels = c, tokens = n*w*h ---------------------------
    ys_s[...] = mab(xs_s[...], wsq_ref, bsq_ref, wsk_ref, bsk_ref, wsv_ref,
                    bsv_ref, gs_ref[0, 0], 1.0 / float(c) ** 0.5)

    # ---- _reshape_for_semantics(backward) + final view: -> (n, c, wh) --------
    for i in range(n):
        o_ref[i] = ys_s[:, i * wh:(i + 1) * wh].astype(o_ref.dtype)


# ----------------------------------------------------------------------------
# Wrapper: one pallas_call, grid over batch only.
# ----------------------------------------------------------------------------
def decoder_forward(z, flat_params, *, n):
    """z: (bs, m, c, w, h).  flat_params: output of prepare_params()."""
    bs, m, c, w, h = z.shape
    wh = w * h
    # (bs, m, c, w, h) -> (bs, m*c, w*h): free reshape, no data movement.
    z2 = z.reshape(bs, m * c, wh)

    def full(a):          # whole (small) parameter array as one VMEM block
        return pl.BlockSpec(a.shape, lambda b: (0,) * a.ndim)

    smem_scalar = pl.BlockSpec(memory_space=pltpu.MemorySpace.SMEM)
    # gammas are the only (1, 1) params -> SMEM scalars; everything else VMEM.
    param_specs = [smem_scalar if p.shape == (1, 1) else full(p)
                   for p in flat_params]

    kernel = functools.partial(_decoder_kernel, n=n, c=c, wh=wh)
    out = pl.pallas_call(
        kernel,
        out_shape=jax.ShapeDtypeStruct((bs, n, c, wh), jnp.float32),
        grid=(bs,),
        in_specs=[pl.BlockSpec((None, m * c, wh), lambda b: (b, 0, 0))] + param_specs,
        out_specs=pl.BlockSpec((None, n, c, wh), lambda b: (b, 0, 0, 0)),
        scratch_shapes=[
            pltpu.VMEM((n * c, wh), jnp.float32),     # yd_s: d_attention result
            pltpu.VMEM((c, n * wh), jnp.float32),     # xs_s: semantics layout
            pltpu.VMEM((c, n * wh), jnp.float32),     # ys_s: s_attention result
        ],
        compiler_params=pltpu.CompilerParams(
            dimension_semantics=("parallel",)),       # batch -> 2 TCs on v7x
    )(z2, *flat_params)
    return out.reshape(bs, n, c, w, h)


# ----------------------------------------------------------------------------
# Parameters (deterministic, synthetic) + one-time kernel-layout prep.
# ----------------------------------------------------------------------------
def init_params(key, c, m, n):
    """'Natural' module parameters: W:(Cout, Cin), b:(Cout, 1), gamma:(1, 1)."""
    keys = jax.random.split(key, 10)

    def lin(k, cout, cin, scale=0.1):
        kw, kb = jax.random.split(k)
        return (scale * jax.random.normal(kw, (cout, cin), jnp.float32),
                scale * jax.random.normal(kb, (cout, 1), jnp.float32))

    return {
        # fusion = BottleneckLayer3D(m, n) ; BottleneckLayer3D(n, n)
        "f1a": lin(keys[0], n, m),
        "f1b": lin(keys[1], n, n),
        "f2a": lin(keys[2], n, n),
        "f2b": lin(keys[3], n, n),
        # d_attention = MAB((c*n, w, h))
        "d_q": lin(keys[4], c * n, c * n),
        "d_k": lin(keys[5], c * n, c * n),
        "d_v": lin(keys[6], c * n, c * n),
        "d_gamma": jnp.full((1, 1), 0.5, jnp.float32),
        # s_attention = MAB((c, w*n, h))
        "s_q": lin(keys[7], c, c),
        "s_k": lin(keys[8], c, c),
        "s_v": lin(keys[9], c, c),
        "s_gamma": jnp.full((1, 1), 0.5, jnp.float32),
    }


def prepare_params(params, c):
    """One-time weight prep: Kronecker-expand the pointwise-Conv3d weights with
    I_c so the conv chain runs directly on the (seq*c, w*h) channels-first layout
    (mathematically identical to Conv3d(kernel_size=1))."""
    eye = jnp.eye(c, dtype=jnp.float32)

    def expand(wb):
        w_, b_ = wb
        return jnp.kron(w_, eye), jnp.repeat(b_, c, axis=0)

    flat = []
    for name in ("f1a", "f1b", "f2a", "f2b"):
        flat.extend(expand(params[name]))
    for name in ("d_q", "d_k", "d_v"):
        flat.extend(params[name])
    flat.append(params["d_gamma"])
    for name in ("s_q", "s_k", "s_v"):
        flat.extend(params[name])
    flat.append(params["s_gamma"])
    return tuple(flat)


# ----------------------------------------------------------------------------
# Pure-JAX reference mirroring the torch module graph (for correctness check).
# ----------------------------------------------------------------------------
def decoder_reference(z, params, *, n):
    bs, m, c, w, h = z.shape

    x = z
    for name in ("f1a", "f1b", "f2a", "f2b"):
        w_, b_ = params[name]
        x = jnp.einsum("oi,bixyz->boxyz", w_, x) + b_[:, 0][None, :, None, None, None]
        x = jnp.maximum(x, 0.0)
    out5 = x                                                   # (bs, n, c, w, h)

    def mab_ref(x4, wq, bq, wk, bk, wv, bv, gamma):
        b_, C, H, W = x4.shape
        xm = x4.reshape(b_, C, H * W)
        q = jnp.einsum("oc,bcn->bon", wq, xm) + bq[None]
        k = jnp.einsum("oc,bcn->bon", wk, xm) + bk[None]
        v = jnp.einsum("oc,bcn->bon", wv, xm) + bv[None]
        s = jnp.einsum("bci,bcj->bij", q, k) / jnp.sqrt(jnp.float32(C))
        attn = jax.nn.softmax(s, axis=-1)
        o = jnp.einsum("bij,bcj->bci", attn, v)
        return (xm + gamma[0, 0] * o).reshape(b_, C, H, W)

    # _reshape_for_dynamics(True/False) == channel cat/stack == plain reshapes
    dyn = out5.reshape(bs, n * c, w, h)
    dyn = mab_ref(dyn, *params["d_q"], *params["d_k"], *params["d_v"],
                  params["d_gamma"])
    out5 = dyn.reshape(bs, n, c, w, h)

    # _reshape_for_semantics(True/False) == cat/stack along the w axis
    sem = jnp.concatenate([out5[:, i] for i in range(n)], axis=-2)   # (bs,c,n*w,h)
    sem = mab_ref(sem, *params["s_q"], *params["s_k"], *params["s_v"],
                  params["s_gamma"])
    out5 = jnp.stack([sem[:, :, i * w:(i + 1) * w] for i in range(n)], axis=1)
    return out5


if __name__ == "__main__":
    latent_shape = (4, 8, 8)      # (c, w, h)
    m, n = 8, 3
    bs = 2
    c, w, h = latent_shape

    key = jax.random.PRNGKey(0)
    kz, kp = jax.random.split(key)
    z = jax.random.normal(kz, (bs, m, c, w, h), jnp.float32)
    params = init_params(kp, c, m, n)
    flat_params = prepare_params(params, c)    # one-time weight prep (outside jit)

    fwd = jax.jit(functools.partial(decoder_forward, n=n))
    out = jax.block_until_ready(fwd(z, flat_params))

    assert out.shape == (bs, n, c, w, h), out.shape
    assert bool(jnp.all(jnp.isfinite(out)))

    ref = decoder_reference(z, params, n=n)
    err = float(jnp.max(jnp.abs(out - ref)))
    assert bool(jnp.allclose(out, ref, rtol=2e-2, atol=2e-3)), f"max_abs_err={err}"

    print("KERNEL_OK")
</pallas_src>

<mosaic_0001>
module attributes {stable_mosaic.version = 11 : i64} {
  func.func @_decoder_kernel(%arg0: i32, %arg1: memref<1x32x64xf32, #tpu.memory_space<vmem>>, %arg2: memref<12x32xf32, #tpu.memory_space<vmem>>, %arg3: memref<12x1xf32, #tpu.memory_space<vmem>>, %arg4: memref<12x12xf32, #tpu.memory_space<vmem>>, %arg5: memref<12x1xf32, #tpu.memory_space<vmem>>, %arg6: memref<12x12xf32, #tpu.memory_space<vmem>>, %arg7: memref<12x1xf32, #tpu.memory_space<vmem>>, %arg8: memref<12x12xf32, #tpu.memory_space<vmem>>, %arg9: memref<12x1xf32, #tpu.memory_space<vmem>>, %arg10: memref<12x12xf32, #tpu.memory_space<vmem>>, %arg11: memref<12x1xf32, #tpu.memory_space<vmem>>, %arg12: memref<12x12xf32, #tpu.memory_space<vmem>>, %arg13: memref<12x1xf32, #tpu.memory_space<vmem>>, %arg14: memref<12x12xf32, #tpu.memory_space<vmem>>, %arg15: memref<12x1xf32, #tpu.memory_space<vmem>>, %arg16: memref<1x1xf32, #tpu.memory_space<smem>>, %arg17: memref<4x4xf32, #tpu.memory_space<vmem>>, %arg18: memref<4x1xf32, #tpu.memory_space<vmem>>, %arg19: memref<4x4xf32, #tpu.memory_space<vmem>>, %arg20: memref<4x1xf32, #tpu.memory_space<vmem>>, %arg21: memref<4x4xf32, #tpu.memory_space<vmem>>, %arg22: memref<4x1xf32, #tpu.memory_space<vmem>>, %arg23: memref<1x1xf32, #tpu.memory_space<smem>>, %arg24: memref<1x3x4x64xf32, #tpu.memory_space<vmem>>, %arg25: memref<12x64xf32, #tpu.memory_space<vmem>>, %arg26: memref<4x192xf32, #tpu.memory_space<vmem>>, %arg27: memref<4x192xf32, #tpu.memory_space<vmem>>) attributes {dimension_semantics = [#tpu.dimension_semantics<parallel>], iteration_bounds = array<i64: 2>, scalar_prefetch = 0 : i64, scratch_operands = 3 : i64, tpu.core_type = #tpu.core_type<tc>, window_params = [{transform_indices = @transform_0, window_bounds = array<i64: 1, 32, 64>}, {pipeline_mode = #tpu.pipeline_mode<synchronous>, transform_indices = @transform_1, window_bounds = array<i64: 12, 32>}, {pipeline_mode = #tpu.pipeline_mode<synchronous>, transform_indices = @transform_2, window_bounds = array<i64: 12, 1>}, {pipeline_mode = #tpu.pipeline_mode<synchronous>, transform_indices = @transform_3, window_bounds = array<i64: 12, 12>}, {pipeline_mode = #tpu.pipeline_mode<synchronous>, transform_indices = @transform_4, window_bounds = array<i64: 12, 1>}, {pipeline_mode = #tpu.pipeline_mode<synchronous>, transform_indices = @transform_5, window_bounds = array<i64: 12, 12>}, {pipeline_mode = #tpu.pipeline_mode<synchronous>, transform_indices = @transform_6, window_bounds = array<i64: 12, 1>}, {pipeline_mode = #tpu.pipeline_mode<synchronous>, transform_indices = @transform_7, window_bounds = array<i64: 12, 12>}, {pipeline_mode = #tpu.pipeline_mode<synchronous>, transform_indices = @transform_8, window_bounds = array<i64: 12, 1>}, {pipeline_mode = #tpu.pipeline_mode<synchronous>, transform_indices = @transform_9, window_bounds = array<i64: 12, 12>}, {pipeline_mode = #tpu.pipeline_mode<synchronous>, transform_indices = @transform_10, window_bounds = array<i64: 12, 1>}, {pipeline_mode = #tpu.pipeline_mode<synchronous>, transform_indices = @transform_11, window_bounds = array<i64: 12, 12>}, {pipeline_mode = #tpu.pipeline_mode<synchronous>, transform_indices = @transform_12, window_bounds = array<i64: 12, 1>}, {pipeline_mode = #tpu.pipeline_mode<synchronous>, transform_indices = @transform_13, window_bounds = array<i64: 12, 12>}, {pipeline_mode = #tpu.pipeline_mode<synchronous>, transform_indices = @transform_14, window_bounds = array<i64: 12, 1>}, {transform_indices = @transform_15, window_bounds = array<i64: 1, 1>}, {pipeline_mode = #tpu.pipeline_mode<synchronous>, transform_indices = @transform_16, window_bounds = array<i64: 4, 4>}, {pipeline_mode = #tpu.pipeline_mode<synchronous>, transform_indices = @transform_17, window_bounds = array<i64: 4, 1>}, {pipeline_mode = #tpu.pipeline_mode<synchronous>, transform_indices = @transform_18, window_bounds = array<i64: 4, 4>}, {pipeline_mode = #tpu.pipeline_mode<synchronous>, transform_indices = @transform_19, window_bounds = array<i64: 4, 1>}, {pipeline_mode = #tpu.pipeline_mode<synchronous>, transform_indices = @transform_20, window_bounds = array<i64: 4, 4>}, {pipeline_mode = #tpu.pipeline_mode<synchronous>, transform_indices = @transform_21, window_bounds = array<i64: 4, 1>}, {transform_indices = @transform_22, window_bounds = array<i64: 1, 1>}, {transform_indices = @transform_23, window_bounds = array<i64: 1, 3, 4, 64>}]} {
    %c0 = arith.constant 0 : index
    %c0_0 = arith.constant 0 : index
    %c0_1 = arith.constant 0 : index
    %0 = vector.load %arg1[%c0, %c0_0, %c0_1] : memref<1x32x64xf32, #tpu.memory_space<vmem>>, vector<1x32x64xf32>
    %1 = vector.shape_cast %0 : vector<1x32x64xf32> to vector<32x64xf32>
    %c0_2 = arith.constant 0 : index
    %c0_3 = arith.constant 0 : index
    %2 = vector.load %arg2[%c0_2, %c0_3] : memref<12x32xf32, #tpu.memory_space<vmem>>, vector<12x32xf32>
    %cst = arith.constant dense<0.000000e+00> : vector<12x64xf32>
    %3 = tpu.matmul %2, %1, %cst {dimension_numbers = #tpu.dot_dimension_numbers<[1], [0], [0], [1], [0, 0, 1, 1], [], []>} : vector<12x32xf32>, vector<32x64xf32>, vector<12x64xf32> -> vector<12x64xf32>
    %c0_4 = arith.constant 0 : index
    %c0_5 = arith.constant 0 : index
    %4 = vector.load %arg3[%c0_4, %c0_5] : memref<12x1xf32, #tpu.memory_space<vmem>>, vector<12x1xf32>
    %5 = vector.broadcast %4 : vector<12x1xf32> to vector<12x64xf32>
    %6 = arith.addf %3, %5 : vector<12x64xf32>
    %cst_6 = arith.constant 0.000000e+00 : f32
    %7 = vector.broadcast %cst_6 : f32 to vector<12x64xf32>
    %8 = arith.maximumf %6, %7 : vector<12x64xf32>
    %c0_7 = arith.constant 0 : index
    %c0_8 = arith.constant 0 : index
    %9 = vector.load %arg4[%c0_7, %c0_8] : memref<12x12xf32, #tpu.memory_space<vmem>>, vector<12x12xf32>
    %cst_9 = arith.constant dense<0.000000e+00> : vector<12x64xf32>
    %10 = tpu.matmul %9, %8, %cst_9 {dimension_numbers = #tpu.dot_dimension_numbers<[1], [0], [0], [1], [0, 0, 1, 1], [], []>} : vector<12x12xf32>, vector<12x64xf32>, vector<12x64xf32> -> vector<12x64xf32>
    %c0_10 = arith.constant 0 : index
    %c0_11 = arith.constant 0 : index
    %11 = vector.load %arg5[%c0_10, %c0_11] : memref<12x1xf32, #tpu.memory_space<vmem>>, vector<12x1xf32>
    %12 = vector.broadcast %11 : vector<12x1xf32> to vector<12x64xf32>
    %13 = arith.addf %10, %12 : vector<12x64xf32>
    %cst_12 = arith.constant 0.000000e+00 : f32
    %14 = vector.broadcast %cst_12 : f32 to vector<12x64xf32>
    %15 = arith.maximumf %13, %14 : vector<12x64xf32>
    %c0_13 = arith.constant 0 : index
    %c0_14 = arith.constant 0 : index
    %16 = vector.load %arg6[%c0_13, %c0_14] : memref<12x12xf32, #tpu.memory_space<vmem>>, vector<12x12xf32>
    %cst_15 = arith.constant dense<0.000000e+00> : vector<12x64xf32>
    %17 = tpu.matmul %16, %15, %cst_15 {dimension_numbers = #tpu.dot_dimension_numbers<[1], [0], [0], [1], [0, 0, 1, 1], [], []>} : vector<12x12xf32>, vector<12x64xf32>, vector<12x64xf32> -> vector<12x64xf32>
    %c0_16 = arith.constant 0 : index
    %c0_17 = arith.constant 0 : index
    %18 = vector.load %arg7[%c0_16, %c0_17] : memref<12x1xf32, #tpu.memory_space<vmem>>, vector<12x1xf32>
    %19 = vector.broadcast %18 : vector<12x1xf32> to vector<12x64xf32>
    %20 = arith.addf %17, %19 : vector<12x64xf32>
    %cst_18 = arith.constant 0.000000e+00 : f32
    %21 = vector.broadcast %cst_18 : f32 to vector<12x64xf32>
    %22 = arith.maximumf %20, %21 : vector<12x64xf32>
    %c0_19 = arith.constant 0 : index
    %c0_20 = arith.constant 0 : index
    %23 = vector.load %arg8[%c0_19, %c0_20] : memref<12x12xf32, #tpu.memory_space<vmem>>, vector<12x12xf32>
    %cst_21 = arith.constant dense<0.000000e+00> : vector<12x64xf32>
    %24 = tpu.matmul %23, %22, %cst_21 {dimension_numbers = #tpu.dot_dimension_numbers<[1], [0], [0], [1], [0, 0, 1, 1], [], []>} : vector<12x12xf32>, vector<12x64xf32>, vector<12x64xf32> -> vector<12x64xf32>
    %c0_22 = arith.constant 0 : index
    %c0_23 = arith.constant 0 : index
    %25 = vector.load %arg9[%c0_22, %c0_23] : memref<12x1xf32, #tpu.memory_space<vmem>>, vector<12x1xf32>
    %26 = vector.broadcast %25 : vector<12x1xf32> to vector<12x64xf32>
    %27 = arith.addf %24, %26 : vector<12x64xf32>
    %cst_24 = arith.constant 0.000000e+00 : f32
    %28 = vector.broadcast %cst_24 : f32 to vector<12x64xf32>
    %29 = arith.maximumf %27, %28 : vector<12x64xf32>
    %c0_25 = arith.constant 0 : index
    %c0_26 = arith.constant 0 : index
    %30 = memref.load %arg16[%c0_25, %c0_26] : memref<1x1xf32, #tpu.memory_space<smem>>
    %c0_27 = arith.constant 0 : index
    %c0_28 = arith.constant 0 : index
    %31 = vector.load %arg10[%c0_27, %c0_28] : memref<12x12xf32, #tpu.memory_space<vmem>>, vector<12x12xf32>
    %cst_29 = arith.constant dense<0.000000e+00> : vector<12x64xf32>
    %32 = tpu.matmul %31, %29, %cst_29 {dimension_numbers = #tpu.dot_dimension_numbers<[1], [0], [0], [1], [0, 0, 1, 1], [], []>} : vector<12x12xf32>, vector<12x64xf32>, vector<12x64xf32> -> vector<12x64xf32>
    %c0_30 = arith.constant 0 : index
    %c0_31 = arith.constant 0 : index
    %33 = vector.load %arg11[%c0_30, %c0_31] : memref<12x1xf32, #tpu.memory_space<vmem>>, vector<12x1xf32>
    %34 = vector.broadcast %33 : vector<12x1xf32> to vector<12x64xf32>
    %35 = arith.addf %32, %34 : vector<12x64xf32>
    %c0_32 = arith.constant 0 : index
    %c0_33 = arith.constant 0 : index
    %36 = vector.load %arg12[%c0_32, %c0_33] : memref<12x12xf32, #tpu.memory_space<vmem>>, vector<12x12xf32>
    %cst_34 = arith.constant dense<0.000000e+00> : vector<12x64xf32>
    %37 = tpu.matmul %36, %29, %cst_34 {dimension_numbers = #tpu.dot_dimension_numbers<[1], [0], [0], [1], [0, 0, 1, 1], [], []>} : vector<12x12xf32>, vector<12x64xf32>, vector<12x64xf32> -> vector<12x64xf32>
    %c0_35 = arith.constant 0 : index
    %c0_36 = arith.constant 0 : index
    %38 = vector.load %arg13[%c0_35, %c0_36] : memref<12x1xf32, #tpu.memory_space<vmem>>, vector<12x1xf32>
    %39 = vector.broadcast %38 : vector<12x1xf32> to vector<12x64xf32>
    %40 = arith.addf %37, %39 : vector<12x64xf32>
    %c0_37 = arith.constant 0 : index
    %c0_38 = arith.constant 0 : index
    %41 = vector.load %arg14[%c0_37, %c0_38] : memref<12x12xf32, #tpu.memory_space<vmem>>, vector<12x12xf32>
    %cst_39 = arith.constant dense<0.000000e+00> : vector<12x64xf32>
    %42 = tpu.matmul %41, %29, %cst_39 {dimension_numbers = #tpu.dot_dimension_numbers<[1], [0], [0], [1], [0, 0, 1, 1], [], []>} : vector<12x12xf32>, vector<12x64xf32>, vector<12x64xf32> -> vector<12x64xf32>
    %c0_40 = arith.constant 0 : index
    %c0_41 = arith.constant 0 : index
    %43 = vector.load %arg15[%c0_40, %c0_41] : memref<12x1xf32, #tpu.memory_space<vmem>>, vector<12x1xf32>
    %44 = vector.broadcast %43 : vector<12x1xf32> to vector<12x64xf32>
    %45 = arith.addf %42, %44 : vector<12x64xf32>
    %cst_42 = arith.constant 0.288675129 : f32
    %46 = vector.broadcast %cst_42 : f32 to vector<12x64xf32>
    %47 = arith.mulf %35, %46 : vector<12x64xf32>
    %48 = tpu.transpose %47, [1, 0] : vector<12x64xf32> -> vector<64x12xf32>
    %cst_43 = arith.constant dense<0.000000e+00> : vector<64x64xf32>
    %49 = tpu.matmul %48, %40, %cst_43 {dimension_numbers = #tpu.dot_dimension_numbers<[1], [0], [0], [1], [0, 0, 1, 1], [], []>} : vector<64x12xf32>, vector<12x64xf32>, vector<64x64xf32> -> vector<64x64xf32>
    %cst_44 = arith.constant dense<0xFF800000> : vector<64xf32>
    %50 = vector.multi_reduction <maximumf>, %49, %cst_44 [1] : vector<64x64xf32> to vector<64xf32>
    %51 = vector.shape_cast %50 : vector<64xf32> to vector<64x1xf32>
    %52 = vector.broadcast %51 : vector<64x1xf32> to vector<64x64xf32>
    %53 = arith.subf %49, %52 : vector<64x64xf32>
    %54 = math.exp %53 : vector<64x64xf32>
    %cst_45 = arith.constant dense<0.000000e+00> : vector<64xf32>
    %55 = vector.multi_reduction <add>, %54, %cst_45 [1] : vector<64x64xf32> to vector<64xf32>
    %56 = vector.shape_cast %55 : vector<64xf32> to vector<64x1xf32>
    %57 = tpu.reciprocal %56 {approx = true} : vector<64x1xf32> -> vector<64x1xf32>
    %58 = vector.broadcast %57 : vector<64x1xf32> to vector<64x64xf32>
    %59 = arith.mulf %54, %58 : vector<64x64xf32>
    %cst_46 = arith.constant dense<0.000000e+00> : vector<12x64xf32>
    %60 = tpu.matmul %45, %59, %cst_46 {dimension_numbers = #tpu.dot_dimension_numbers<[1], [1], [0], [0], [0, 0, 1, 0], [], []>} : vector<12x64xf32>, vector<64x64xf32>, vector<12x64xf32> -> vector<12x64xf32>
    %61 = vector.broadcast %30 : f32 to vector<12x64xf32>
    %62 = arith.mulf %61, %60 : vector<12x64xf32>
    %63 = arith.addf %29, %62 : vector<12x64xf32>
    %c0_47 = arith.constant 0 : index
    %c0_48 = arith.constant 0 : index
    %64 = vector.load %arg25[%c0_47, %c0_48] : memref<12x64xf32, #tpu.memory_space<vmem>>, vector<12x64xf32>
    tpu.vector_store %arg25[%c0_47, %c0_48], %63 {strides = array<i32>} : memref<12x64xf32, #tpu.memory_space<vmem>>, vector<12x64xf32>,
    %c0_49 = arith.constant 0 : index
    %c0_50 = arith.constant 0 : index
    %65 = vector.load %arg25[%c0_49, %c0_50] : memref<12x64xf32, #tpu.memory_space<vmem>>, vector<4x64xf32>
    %c0_51 = arith.constant 0 : index
    %c0_52 = arith.constant 0 : index
    %66 = vector.load %arg26[%c0_51, %c0_52] : memref<4x192xf32, #tpu.memory_space<vmem>>, vector<4x64xf32>
    tpu.vector_store %arg26[%c0_51, %c0_52], %65 {strides = array<i32>} : memref<4x192xf32, #tpu.memory_space<vmem>>, vector<4x64xf32>,
    %c4 = arith.constant 4 : index
    %c0_53 = arith.constant 0 : index
    %67 = vector.load %arg25[%c4, %c0_53] : memref<12x64xf32, #tpu.memory_space<vmem>>, vector<4x64xf32>
    %c0_54 = arith.constant 0 : index
    %c64 = arith.constant 64 : index
    %68 = vector.load %arg26[%c0_54, %c64] : memref<4x192xf32, #tpu.memory_space<vmem>>, vector<4x64xf32>
    tpu.vector_store %arg26[%c0_54, %c64], %67 {strides = array<i32>} : memref<4x192xf32, #tpu.memory_space<vmem>>, vector<4x64xf32>,
    %c8 = arith.constant 8 : index
    %c0_55 = arith.constant 0 : index
    %69 = vector.load %arg25[%c8, %c0_55] : memref<12x64xf32, #tpu.memory_space<vmem>>, vector<4x64xf32>
    %c0_56 = arith.constant 0 : index
    %c128 = arith.constant 128 : index
    %70 = vector.load %arg26[%c0_56, %c128] : memref<4x192xf32, #tpu.memory_space<vmem>>, vector<4x64xf32>
    tpu.vector_store %arg26[%c0_56, %c128], %69 {strides = array<i32>} : memref<4x192xf32, #tpu.memory_space<vmem>>, vector<4x64xf32>,
    %c0_57 = arith.constant 0 : index
    %c0_58 = arith.constant 0 : index
    %71 = vector.load %arg26[%c0_57, %c0_58] : memref<4x192xf32, #tpu.memory_space<vmem>>, vector<4x192xf32>
    %c0_59 = arith.constant 0 : index
    %c0_60 = arith.constant 0 : index
    %72 = memref.load %arg23[%c0_59, %c0_60] : memref<1x1xf32, #tpu.memory_space<smem>>
    %c0_61 = arith.constant 0 : index
    %c0_62 = arith.constant 0 : index
    %73 = vector.load %arg17[%c0_61, %c0_62] : memref<4x4xf32, #tpu.memory_space<vmem>>, vector<4x4xf32>
    %cst_63 = arith.constant dense<0.000000e+00> : vector<4x192xf32>
    %74 = tpu.matmul %73, %71, %cst_63 {dimension_numbers = #tpu.dot_dimension_numbers<[1], [0], [0], [1], [0, 0, 1, 1], [], []>} : vector<4x4xf32>, vector<4x192xf32>, vector<4x192xf32> -> vector<4x192xf32>
    %c0_64 = arith.constant 0 : index
    %c0_65 = arith.constant 0 : index
    %75 = vector.load %arg18[%c0_64, %c0_65] : memref<4x1xf32, #tpu.memory_space<vmem>>, vector<4x1xf32>
    %76 = vector.broadcast %75 : vector<4x1xf32> to vector<4x192xf32>
    %77 = arith.addf %74, %76 : vector<4x192xf32>
    %c0_66 = arith.constant 0 : index
    %c0_67 = arith.constant 0 : index
    %78 = vector.load %arg19[%c0_66, %c0_67] : memref<4x4xf32, #tpu.memory_space<vmem>>, vector<4x4xf32>
    %cst_68 = arith.constant dense<0.000000e+00> : vector<4x192xf32>
    %79 = tpu.matmul %78, %71, %cst_68 {dimension_numbers = #tpu.dot_dimension_numbers<[1], [0], [0], [1], [0, 0, 1, 1], [], []>} : vector<4x4xf32>, vector<4x192xf32>, vector<4x192xf32> -> vector<4x192xf32>
    %c0_69 = arith.constant 0 : index
    %c0_70 = arith.constant 0 : index
    %80 = vector.load %arg20[%c0_69, %c0_70] : memref<4x1xf32, #tpu.memory_space<vmem>>, vector<4x1xf32>
    %81 = vector.broadcast %80 : vector<4x1xf32> to vector<4x192xf32>
    %82 = arith.addf %79, %81 : vector<4x192xf32>
    %c0_71 = arith.constant 0 : index
    %c0_72 = arith.constant 0 : index
    %83 = vector.load %arg21[%c0_71, %c0_72] : memref<4x4xf32, #tpu.memory_space<vmem>>, vector<4x4xf32>
    %cst_73 = arith.constant dense<0.000000e+00> : vector<4x192xf32>
    %84 = tpu.matmul %83, %71, %cst_73 {dimension_numbers = #tpu.dot_dimension_numbers<[1], [0], [0], [1], [0, 0, 1, 1], [], []>} : vector<4x4xf32>, vector<4x192xf32>, vector<4x192xf32> -> vector<4x192xf32>
    %c0_74 = arith.constant 0 : index
    %c0_75 = arith.constant 0 : index
    %85 = vector.load %arg22[%c0_74, %c0_75] : memref<4x1xf32, #tpu.memory_space<vmem>>, vector<4x1xf32>
    %86 = vector.broadcast %85 : vector<4x1xf32> to vector<4x192xf32>
    %87 = arith.addf %84, %86 : vector<4x192xf32>
    %cst_76 = arith.constant 5.000000e-01 : f32
    %88 = vector.broadcast %cst_76 : f32 to vector<4x192xf32>
    %89 = arith.mulf %77, %88 : vector<4x192xf32>
    %90 = tpu.transpose %89, [1, 0] : vector<4x192xf32> -> vector<192x4xf32>
    %cst_77 = arith.constant dense<0.000000e+00> : vector<192x192xf32>
    %91 = tpu.matmul %90, %82, %cst_77 {dimension_numbers = #tpu.dot_dimension_numbers<[1], [0], [0], [1], [0, 0, 1, 1], [], []>} : vector<192x4xf32>, vector<4x192xf32>, vector<192x192xf32> -> vector<192x192xf32>
    %cst_78 = arith.constant dense<0xFF800000> : vector<192xf32>
    %92 = vector.multi_reduction <maximumf>, %91, %cst_78 [1] : vector<192x192xf32> to vector<192xf32>
    %93 = vector.shape_cast %92 : vector<192xf32> to vector<192x1xf32>
    %94 = vector.broadcast %93 : vector<192x1xf32> to vector<192x192xf32>
    %95 = arith.subf %91, %94 : vector<192x192xf32>
    %96 = math.exp %95 : vector<192x192xf32>
    %cst_79 = arith.constant dense<0.000000e+00> : vector<192xf32>
    %97 = vector.multi_reduction <add>, %96, %cst_79 [1] : vector<192x192xf32> to vector<192xf32>
    %98 = vector.shape_cast %97 : vector<192xf32> to vector<192x1xf32>
    %99 = tpu.reciprocal %98 {approx = true} : vector<192x1xf32> -> vector<192x1xf32>
    %100 = vector.broadcast %99 : vector<192x1xf32> to vector<192x192xf32>
    %101 = arith.mulf %96, %100 : vector<192x192xf32>
    %cst_80 = arith.constant dense<0.000000e+00> : vector<4x192xf32>
    %102 = tpu.matmul %87, %101, %cst_80 {dimension_numbers = #tpu.dot_dimension_numbers<[1], [1], [0], [0], [0, 0, 1, 0], [], []>} : vector<4x192xf32>, vector<192x192xf32>, vector<4x192xf32> -> vector<4x192xf32>
    %103 = vector.broadcast %72 : f32 to vector<4x192xf32>
    %104 = arith.mulf %103, %102 : vector<4x192xf32>
    %105 = arith.addf %71, %104 : vector<4x192xf32>
    %c0_81 = arith.constant 0 : index
    %c0_82 = arith.constant 0 : index
    %106 = vector.load %arg27[%c0_81, %c0_82] : memref<4x192xf32, #tpu.memory_space<vmem>>, vector<4x192xf32>
    tpu.vector_store %arg27[%c0_81, %c0_82], %105 {strides = array<i32>} : memref<4x192xf32, #tpu.memory_space<vmem>>, vector<4x192xf32>,
    %c0_83 = arith.constant 0 : index
    %c0_84 = arith.constant 0 : index
    %107 = vector.load %arg27[%c0_83, %c0_84] : memref<4x192xf32, #tpu.memory_space<vmem>>, vector<4x64xf32>
    %c0_85 = arith.constant 0 : index
    %c0_86 = arith.constant 0 : index
    %c0_87 = arith.constant 0 : index
    %c0_88 = arith.constant 0 : index
    %108 = vector.load %arg24[%c0_85, %c0_86, %c0_87, %c0_88] : memref<1x3x4x64xf32, #tpu.memory_space<vmem>>, vector<1x1x4x64xf32>
    %109 = vector.shape_cast %108 : vector<1x1x4x64xf32> to vector<4x64xf32>
    %110 = vector.shape_cast %107 : vector<4x64xf32> to vector<1x1x4x64xf32>
    tpu.vector_store %arg24[%c0_85, %c0_86, %c0_87, %c0_88], %110 {strides = array<i32>} : memref<1x3x4x64xf32, #tpu.memory_space<vmem>>, vector<1x1x4x64xf32>,
    %c0_89 = arith.constant 0 : index
    %c64_90 = arith.constant 64 : index
    %111 = vector.load %arg27[%c0_89, %c64_90] : memref<4x192xf32, #tpu.memory_space<vmem>>, vector<4x64xf32>
    %c0_91 = arith.constant 0 : index
    %c1 = arith.constant 1 : index
    %c0_92 = arith.constant 0 : index
    %c0_93 = arith.constant 0 : index
    %112 = vector.load %arg24[%c0_91, %c1, %c0_92, %c0_93] : memref<1x3x4x64xf32, #tpu.memory_space<vmem>>, vector<1x1x4x64xf32>
    %113 = vector.shape_cast %112 : vector<1x1x4x64xf32> to vector<4x64xf32>
    %114 = vector.shape_cast %111 : vector<4x64xf32> to vector<1x1x4x64xf32>
    tpu.vector_store %arg24[%c0_91, %c1, %c0_92, %c0_93], %114 {strides = array<i32>} : memref<1x3x4x64xf32, #tpu.memory_space<vmem>>, vector<1x1x4x64xf32>,
    %c0_94 = arith.constant 0 : index
    %c128_95 = arith.constant 128 : index
    %115 = vector.load %arg27[%c0_94, %c128_95] : memref<4x192xf32, #tpu.memory_space<vmem>>, vector<4x64xf32>
    %c0_96 = arith.constant 0 : index
    %c2 = arith.constant 2 : index
    %c0_97 = arith.constant 0 : index
    %c0_98 = arith.constant 0 : index
    %116 = vector.load %arg24[%c0_96, %c2, %c0_97, %c0_98] : memref<1x3x4x64xf32, #tpu.memory_space<vmem>>, vector<1x1x4x64xf32>
    %117 = vector.shape_cast %116 : vector<1x1x4x64xf32> to vector<4x64xf32>
    %118 = vector.shape_cast %115 : vector<4x64xf32> to vector<1x1x4x64xf32>
    tpu.vector_store %arg24[%c0_96, %c2, %c0_97, %c0_98], %118 {strides = array<i32>} : memref<1x3x4x64xf32, #tpu.memory_space<vmem>>, vector<1x1x4x64xf32>,
    return
  }
  func.func @transform_0(%arg0: i32) -> (i32, i32, i32) {
    %c0_i32 = arith.constant 0 : i32
    %c0_i32_0 = arith.constant 0 : i32
    %c0_i32_1 = arith.constant 0 : i32
    return %arg0, %c0_i32, %c0_i32_0 : i32, i32, i32
  }
  func.func @transform_1(%arg0: i32) -> (i32, i32) {
    %c0_i32 = arith.constant 0 : i32
    %c0_i32_0 = arith.constant 0 : i32
    %c0_i32_1 = arith.constant 0 : i32
    return %c0_i32, %c0_i32_0 : i32, i32
  }
  func.func @transform_2(%arg0: i32) -> (i32, i32) {
    %c0_i32 = arith.constant 0 : i32
    %c0_i32_0 = arith.constant 0 : i32
    %c0_i32_1 = arith.constant 0 : i32
    return %c0_i32, %c0_i32_0 : i32, i32
  }
  func.func @transform_3(%arg0: i32) -> (i32, i32) {
    %c0_i32 = arith.constant 0 : i32
    %c0_i32_0 = arith.constant 0 : i32
    %c0_i32_1 = arith.constant 0 : i32
    return %c0_i32, %c0_i32_0 : i32, i32
  }
  func.func @transform_4(%arg0: i32) -> (i32, i32) {
    %c0_i32 = arith.constant 0 : i32
    %c0_i32_0 = arith.constant 0 : i32
    %c0_i32_1 = arith.constant 0 : i32
    return %c0_i32, %c0_i32_0 : i32, i32
  }
  func.func @transform_5(%arg0: i32) -> (i32, i32) {
    %c0_i32 = arith.constant 0 : i32
    %c0_i32_0 = arith.constant 0 : i32
    %c0_i32_1 = arith.constant 0 : i32
    return %c0_i32, %c0_i32_0 : i32, i32
  }
  func.func @transform_6(%arg0: i32) -> (i32, i32) {
    %c0_i32 = arith.constant 0 : i32
    %c0_i32_0 = arith.constant 0 : i32
    %c0_i32_1 = arith.constant 0 : i32
    return %c0_i32, %c0_i32_0 : i32, i32
  }
  func.func @transform_7(%arg0: i32) -> (i32, i32) {
    %c0_i32 = arith.constant 0 : i32
    %c0_i32_0 = arith.constant 0 : i32
    %c0_i32_1 = arith.constant 0 : i32
    return %c0_i32, %c0_i32_0 : i32, i32
  }
  func.func @transform_8(%arg0: i32) -> (i32, i32) {
    %c0_i32 = arith.constant 0 : i32
    %c0_i32_0 = arith.constant 0 : i32
    %c0_i32_1 = arith.constant 0 : i32
    return %c0_i32, %c0_i32_0 : i32, i32
  }
  func.func @transform_9(%arg0: i32) -> (i32, i32) {
    %c0_i32 = arith.constant 0 : i32
    %c0_i32_0 = arith.constant 0 : i32
    %c0_i32_1 = arith.constant 0 : i32
    return %c0_i32, %c0_i32_0 : i32, i32
  }
  func.func @transform_10(%arg0: i32) -> (i32, i32) {
    %c0_i32 = arith.constant 0 : i32
    %c0_i32_0 = arith.constant 0 : i32
    %c0_i32_1 = arith.constant 0 : i32
    return %c0_i32, %c0_i32_0 : i32, i32
  }
  func.func @transform_11(%arg0: i32) -> (i32, i32) {
    %c0_i32 = arith.constant 0 : i32
    %c0_i32_0 = arith.constant 0 : i32
    %c0_i32_1 = arith.constant 0 : i32
    return %c0_i32, %c0_i32_0 : i32, i32
  }
  func.func @transform_12(%arg0: i32) -> (i32, i32) {
    %c0_i32 = arith.constant 0 : i32
    %c0_i32_0 = arith.constant 0 : i32
    %c0_i32_1 = arith.constant 0 : i32
    return %c0_i32, %c0_i32_0 : i32, i32
  }
  func.func @transform_13(%arg0: i32) -> (i32, i32) {
    %c0_i32 = arith.constant 0 : i32
    %c0_i32_0 = arith.constant 0 : i32
    %c0_i32_1 = arith.constant 0 : i32
    return %c0_i32, %c0_i32_0 : i32, i32
  }
  func.func @transform_14(%arg0: i32) -> (i32, i32) {
    %c0_i32 = arith.constant 0 : i32
    %c0_i32_0 = arith.constant 0 : i32
    %c0_i32_1 = arith.constant 0 : i32
    return %c0_i32, %c0_i32_0 : i32, i32
  }
  func.func @transform_15(%arg0: i32) -> (i32, i32) {
    %c0_i32 = arith.constant 0 : i32
    %c0_i32_0 = arith.constant 0 : i32
    %c0_i32_1 = arith.constant 0 : i32
    return %c0_i32, %c0_i32_0 : i32, i32
  }
  func.func @transform_16(%arg0: i32) -> (i32, i32) {
    %c0_i32 = arith.constant 0 : i32
    %c0_i32_0 = arith.constant 0 : i32
    %c0_i32_1 = arith.constant 0 : i32
    return %c0_i32, %c0_i32_0 : i32, i32
  }
  func.func @transform_17(%arg0: i32) -> (i32, i32) {
    %c0_i32 = arith.constant 0 : i32
    %c0_i32_0 = arith.constant 0 : i32
    %c0_i32_1 = arith.constant 0 : i32
    return %c0_i32, %c0_i32_0 : i32, i32
  }
  func.func @transform_18(%arg0: i32) -> (i32, i32) {
    %c0_i32 = arith.constant 0 : i32
    %c0_i32_0 = arith.constant 0 : i32
    %c0_i32_1 = arith.constant 0 : i32
    return %c0_i32, %c0_i32_0 : i32, i32
  }
  func.func @transform_19(%arg0: i32) -> (i32, i32) {
    %c0_i32 = arith.constant 0 : i32
    %c0_i32_0 = arith.constant 0 : i32
    %c0_i32_1 = arith.constant 0 : i32
    return %c0_i32, %c0_i32_0 : i32, i32
  }
  func.func @transform_20(%arg0: i32) -> (i32, i32) {
    %c0_i32 = arith.constant 0 : i32
    %c0_i32_0 = arith.constant 0 : i32
    %c0_i32_1 = arith.constant 0 : i32
    return %c0_i32, %c0_i32_0 : i32, i32
  }
  func.func @transform_21(%arg0: i32) -> (i32, i32) {
    %c0_i32 = arith.constant 0 : i32
    %c0_i32_0 = arith.constant 0 : i32
    %c0_i32_1 = arith.constant 0 : i32
    return %c0_i32, %c0_i32_0 : i32, i32
  }
  func.func @transform_22(%arg0: i32) -> (i32, i32) {
    %c0_i32 = arith.constant 0 : i32
    %c0_i32_0 = arith.constant 0 : i32
    %c0_i32_1 = arith.constant 0 : i32
    return %c0_i32, %c0_i32_0 : i32, i32
  }
  func.func @transform_23(%arg0: i32) -> (i32, i32, i32, i32) {
    %c0_i32 = arith.constant 0 : i32
    %c0_i32_0 = arith.constant 0 : i32
    %c0_i32_1 = arith.constant 0 : i32
    %c0_i32_2 = arith.constant 0 : i32
    return %arg0, %c0_i32, %c0_i32_0, %c0_i32_1 : i32, i32, i32, i32
  }
}

</mosaic_0001>

<bundles_post_ra>
// kernel: decoder_forward.1
= control target key start
LH: loop header
LB: loop body
LE: loop exit
PB: predicated region body
PF: predicated region fallthrough
CT: control target
= control target key end

     0   :  { %s3685_s0 = inlined_call_operand.vmem [shape: f32[2,32,64], index: 0, kind: input, shape index: {}]   ;;  %s3686_s1 = inlined_call_operand.vmem [shape: f32[12,32], index: 1, kind: input, shape index: {}]   ;;  %s3687_s2 = inlined_call_operand.vmem [shape: f32[12,1], index: 2, kind: input, shape index: {}]   ;;  %s3688_s3 = inlined_call_operand.vmem [shape: f32[12,12], index: 3, kind: input, shape index: {}]   ;;  %s3689_s4 = inlined_call_operand.vmem [shape: f32[12,1], index: 4, kind: input, shape index: {}]   ;;  %s3690_s5 = inlined_call_operand.vmem [shape: f32[12,12], index: 5, kind: input, shape index: {}]   ;;  %s3691_s6 = inlined_call_operand.vmem [shape: f32[12,1], index: 6, kind: input, shape index: {}]   ;;  %s3692_s7 = inlined_call_operand.vmem [shape: f32[12,12], index: 7, kind: input, shape index: {}]   ;;  %s3693_s8 = inlined_call_operand.vmem [shape: f32[12,1], index: 8, kind: input, shape index: {}]   ;;  %s3694_s9 = inlined_call_operand.vmem [shape: f32[12,12], index: 9, kind: input, shape index: {}]   ;;  %s3695_s10 = inlined_call_operand.vmem [shape: f32[12,1], index: 10, kind: input, shape index: {}]   ;;  %s3696_s11 = inlined_call_operand.vmem [shape: f32[12,12], index: 11, kind: input, shape index: {}]   ;;  %s3697_s12 = inlined_call_operand.vmem [shape: f32[12,1], index: 12, kind: input, shape index: {}]   ;;  %s3698_s13 = inlined_call_operand.vmem [shape: f32[12,12], index: 13, kind: input, shape index: {}]   ;;  %s3699_s14 = inlined_call_operand.vmem [shape: f32[12,1], index: 14, kind: input, shape index: {}]   ;;  %s3700_s15 = inlined_call_operand.<no memory space> [shape: f32[1,1], index: 15, kind: input, shape index: {}]   ;;  %s3701_s16 = inlined_call_operand.vmem [shape: f32[4,4], index: 16, kind: input, shape index: {}]   ;;  %s3702_s17 = inlined_call_operand.vmem [shape: f32[4,1], index: 17, kind: input, shape index: {}]   ;;  %s3703_s18 = inlined_call_operand.vmem [shape: f32[4,4], index: 18, kind: input, shape index: {}]   ;;  %s3704_s19 = inlined_call_operand.vmem [shape: f32[4,1], index: 19, kind: input, shape index: {}]   ;;  %s3705_s20 = inlined_call_operand.vmem [shape: f32[4,4], index: 20, kind: input, shape index: {}]   ;;  %s3706_s21 = inlined_call_operand.vmem [shape: f32[4,1], index: 21, kind: input, shape index: {}]   ;;  %s3707_s22 = inlined_call_operand.<no memory space> [shape: f32[1,1], index: 22, kind: input, shape index: {}]   ;;  %s3708_s23 = inlined_call_operand.vmem [shape: f32[2,3,4,64], index: 23, kind: output, shape index: {}]  }
   0x1   :  { %3722 = sst [smem:[#allocation15_spill]] %s3685_s0 }
   0x2   :  { %3723 = sst [smem:[#allocation16_spill]] %s3686_s1 }
   0x3   :  { %3724 = sst [smem:[#allocation17_spill]] %s3687_s2 }
   0x4   :  { %3725 = sst [smem:[#allocation18_spill]] %s3688_s3 }
   0x5   :  { %3726 = sst [smem:[#allocation19_spill]] %s3689_s4 }
   0x6   :  { %3727 = sst [smem:[#allocation20_spill]] %s3690_s5  ;;  %s2913_s5 = smov 0  }
   0x7   :  { %3728 = sst [smem:[#allocation21_spill]] %s3691_s6 }
   0x8   :  { %3729 = sst [smem:[#allocation22_spill]] %s3692_s7 }
   0x9   :  { %28 = sst [smem:[#allocation5]] %s3700_s15 }
   0xa   :  { %29 = sst [smem:[#allocation6]] %s3707_s22 }
   0xb LB: > { %s2446_s1 = sadd.s32 4294967295, %s2783_s5   ;;  %p2450_p0 = scmp.ge.s32.totalorder %s2783_s5, 1  ;;  %s2783_s5 = sphi %s2913_s5, %s35_s5  }
   0xc   : > { %p639_p1 = scmp.lt.s32.totalorder %s2783_s5, 3 }
   0xe   : > { %p640_p2 = pnand %p2450_p0, %p639_p1 }
  0x10   : > { %643 = sbr.rel (%p640_p2) target bundleno = 2901 (0xb55), region = 112 }
  0x15   : > { %s3730_s2 = sld [smem:[#allocation17_spill]]  ;;  %p703_p3 = scmp.lt.s32.totalorder %s2446_s1, 1  ;;  %v2785_v1 = vmov 0   ;;  %vm731_vm0 = vcmask 261120   ;;  %v864_v8 = vld [vmem:[%s3693_s8 + $0x8] sm:$0xf] }
  0x16   : > { %2598 = vset.pattern.permute.xlu0 %v2785_v1  ;;  %2599 = vset.pattern.permute.xlu1 %v2785_v1  ;;  %s3731_s7 = sld [smem:[#allocation15_spill]]  ;;  %v913_v10 = vld [vmem:[%s3695_s10 + $0x8] sm:$0xf]  ;;  %v863_v13 = vld [vmem:[%s3693_s8] sm:$0xff]  ;;  %vm784_vm1 = vcmask 1043456   ;;  %vm777_vm2 = vcmask 97280  }
  0x17   : > { %s3755_s1 = smov (!%p703_p3, %s2446_s1), 1  ;;  %2600 = vset.pattern.permute.xlu2 %v2785_v1  ;;  %s3732_s30 = sld [smem:[#allocation16_spill]]  ;;  %v959_v14 = vld [vmem:[%s3697_s12 + $0x8] sm:$0xf]  ;;  %v912_v29 = vld [vmem:[%s3695_s10] sm:$0xff]  ;;  %vm1144_vm3 = vcmask 523264  }
  0x18   : > { %s2585_s22 = sshll.u32 %s3755_s1, 5  ;;  %s3735_s3 = sld [smem:[#allocation21_spill]]  ;;  %v958_v37 = vld [vmem:[%s3697_s12] sm:$0xff]  ;;  %v911_v58 = vld [vmem:[%s3694_s9 + $0x8] sm:$0xf]  ;;  %vm1292_vm4 = vcmask 519168  }
  0x19   : > { %s3736_s6 = sld [smem:[#allocation20_spill]]  ;;  %v910_v57 = vld [vmem:[%s3694_s9] sm:$0xff]  ;;  %v957_v60 = vld [vmem:[%s3696_s11 + $0x8] sm:$0xf]  ;;  %s2786_s0 = smov 64   ;;  %vm1301_vm5 = vcmask 1043968  }
  0x1a   : > { %s3737_s25 = sld [smem:[#allocation22_spill]]  ;;  %v956_v59 = vld [vmem:[%s3696_s11] sm:$0xff]  ;;  %vm1318_vm6 = vcmask 31744   ;;  %vm2374_vm7 = vcmask 523268   ;;  %s2586_s27 = smul.u32 12, %s3755_s1 }
  0x1b   : > { %v720_v0 = vld [vmem:[%s3730_s2 + $0x8] sm:$0xf]  ;;  %v719_v4 = vld [vmem:[%s3730_s2] sm:$0xff]  ;;  %s909_s29 = sld [smem:[#allocation5]]  ;;  %vm2375_vm8 = vmor %vm2374_vm7, %vm784_vm1 }
  0x1c   : > { %728 = vperm.xlu0 %2598, %v720_v0   ;;  %s707_s28 = scalar_lea.vmem %s3731_s7, %s2585_s22  ;;  %s3734_s22 = sld [smem:[#allocation18_spill]]  ;;  %v999_v61 = vld [vmem:[%s3698_s13] sm:$0xff] }
  0x1d   : > { %v716_v2 = vld [vmem:[%s707_s28 + $0x18] sm:$0xff]  ;;  %v715_v3 = vld [vmem:[%s707_s28 + $0x10] sm:$0xff]  ;;  %v714_v5 = vld [vmem:[%s707_s28 + $0x8] sm:$0xff]  ;;  %s1306_s26 = sld [smem:[#allocation6]]  ;;  %s712_s4 = scalar_lea.vmem %s3708_s23, %s2586_s27 }
  0x1e   : > { %750 = vmatpush.msra.mxu0 %v716_v2  ;;  %v713_v6 = vld [vmem:[%s707_s28] sm:$0xff]  ;;  %v718_v9 = vld [vmem:[%s3732_s30 + $0x8] sm:$0xf]  ;;  %s3733_s28 = sld [smem:[#allocation19_spill]] }
  0x1f   : > { %v717_v7 = vld [vmem:[%s3732_s30] sm:$0xff]  ;;  %v816_v25 = vld [vmem:[%s3735_s3 + $0x8] sm:$0xf] }
  0x20   : > { %751 = vmatpush.msra.mxu0 %v715_v3  ;;  %824 = vperm.xlu2 %2600, %v816_v25   ;;  %v815_v27 = vld [vmem:[%s3735_s3] sm:$0xff]  ;;  %v814_v38 = vld [vmem:[%s3736_s6 + $0x8] sm:$0xf] }
  0x21   : > { %v813_v36 = vld [vmem:[%s3736_s6] sm:$0xff]  ;;  %v862_v48 = vld [vmem:[%s3737_s25 + $0x8] sm:$0xf] }
  0x22   : > { %752 = vmatpush.msra.mxu0 %v714_v5  ;;  %v763_v23 = vld [vmem:[%s3734_s22] sm:$0xff]  ;;  %v764_v24 = vld [vmem:[%s3734_s22 + $0x8] sm:$0xf] }
  0x23   : > { %v861_v47 = vld [vmem:[%s3737_s25] sm:$0xff]  ;;  %v1000_v2 = vld [vmem:[%s3698_s13 + $0x8] sm:$0xf] }
  0x24   : > { %723 = vperm.xlu0 %2598, %v719_v4   ;;  %753 = vmatpush.msra.mxu0 %v713_v6  ;;  %v766_v11 = vld [vmem:[%s3733_s28 + $0x8] sm:$0xf]  ;;  %v765_v12 = vld [vmem:[%s3733_s28] sm:$0xff] }
  0x25   : > { %2454 = vmatmul.msk.f32.vlgmr.msra.gmra.mxu0 %vm731_vm0, %v717_v7  ;;  %774 = vperm.xlu1 %2599, %v766_v11  }
  0x28   : > { %819 = vperm.xlu2 %2600, %v815_v27  }
  0x2c   : > { %872 = vperm.xlu0 %2598, %v864_v8  }
  0x2d   : > { %2455 = vmatmul.msk.f32.gmra.mxu0 %vm731_vm0, %v718_v9  ;;  %769 = vperm.xlu1 %2599, %v765_v12  }
  0x30   : > { %916 = vperm.xlu2 %2600, %v912_v29  }
  0x34   : > { %921 = vperm.xlu0 %2598, %v913_v10  }
  0x35   : > { %867 = vperm.xlu1 %2599, %v863_v13  }
  0x38   : > { %962 = vperm.xlu2 %2600, %v958_v37  }
  0x3d   : > { %967 = vperm.xlu1 %2599, %v959_v14  }
  0x7a   : > { %v825_v39 = vpop.permute.xlu2 %824 }
  0x82   : > { %v820_v41 = vpop.permute.xlu2 %819 }
  0x8a   : > { %v917_v62 = vpop.permute.xlu2 %916 }
  0x8e   : > { %v729_v15 = vpop.permute.xlu0 %728 }
  0x92   : > { %v963_v11 = vpop.permute.xlu2 %962 }
  0x96   : > { %v724_v17 = vpop.permute.xlu0 %723 }
  0x97   : > { %v775_v26 = vpop.permute.xlu1 %774 }
  0x9e   : > { %v873_v50 = vpop.permute.xlu0 %872 }
  0x9f   : > { %v770_v30 = vpop.permute.xlu1 %769 }
  0xa2   : > { %v755_v16 = vpop.f32.mrf.mxu0 }
  0xa3   : > { %v756_v19 = vadd.f32 %v755_v16, %v724_v17 }
  0xa5   : > { %v761_v22 = vmax.f32 %v756_v19, 0.0 }
  0xa6   : > { %v922_v3 = vpop.permute.xlu0 %921 }
  0xa7   : > { %v868_v51 = vpop.permute.xlu1 %867 }
  0xaa   : > { %v758_v18 = vpop.f32.mrf.mxu0 }
  0xab   : > { %v759_v20 = vadd.f32 %v758_v18, %v729_v15 }
  0xad   : > { %v762_v21 = vmax.f32 %v759_v20, 0.0 }
  0xaf   : > { %2456 = vmatpush.msk.msra.mxu1 %vm784_vm1, %v762_v21  ;;  %v968_v8 = vpop.permute.xlu1 %967 }
  0xb1   : > { %803 = vmatpush.msra.mxu1 %v761_v22 }
  0xb2   : > { %2457 = vmatmul.msk.f32.vlgmr.msra.gmra.mxu1 %vm777_vm2, %v763_v23 }
  0xba   : > { %2458 = vmatmul.msk.f32.gmra.mxu1 %vm777_vm2, %v764_v24 }
 0x12f   : > { %v805_v28 = vpop.f32.mrf.mxu1 }
 0x130   : > { %v806_v32 = vadd.f32 %v805_v28, %v770_v30 }
 0x132   : > { %v811_v35 = vmax.f32 %v806_v32, 0.0 }
 0x137   : > { %v808_v31 = vpop.f32.mrf.mxu1 }
 0x138   : > { %v809_v33 = vadd.f32 %v808_v31, %v775_v26 }
 0x13a   : > { %v812_v34 = vmax.f32 %v809_v33, 0.0 }
 0x13c   : > { %2459 = vmatpush.msk.msrb.mxu0 %vm784_vm1, %v812_v34 }
 0x13e   : > { %851 = vmatpush.msrb.mxu0 %v811_v35 }
 0x13f   : > { %2460 = vmatmul.msk.f32.vlgmr.msrb.gmra.mxu0 %vm777_vm2, %v813_v36 }
 0x147   : > { %2461 = vmatmul.msk.f32.gmra.mxu0 %vm777_vm2, %v814_v38 }
 0x1bc   : > { %v853_v40 = vpop.f32.mrf.mxu0 }
 0x1bd   : > { %v854_v43 = vadd.f32 %v853_v40, %v820_v41 }
 0x1bf   : > { %v859_v46 = vmax.f32 %v854_v43, 0.0 }
 0x1c4   : > { %v856_v42 = vpop.f32.mrf.mxu0 }
 0x1c5   : > { %v857_v44 = vadd.f32 %v856_v42, %v825_v39 }
 0x1c7   : > { %v860_v45 = vmax.f32 %v857_v44, 0.0 }
 0x1c9   : > { %2462 = vmatpush.msk.msra.mxu0 %vm784_vm1, %v860_v45 }
 0x1cb   : > { %899 = vmatpush.msra.mxu0 %v859_v46 }
 0x1cc   : > { %2463 = vmatmul.msk.f32.vlgmr.msra.gmra.mxu0 %vm777_vm2, %v861_v47 }
 0x1d4   : > { %2464 = vmatmul.msk.f32.gmra.mxu0 %vm777_vm2, %v862_v48 }
 0x249   : > { %v901_v49 = vpop.f32.mrf.mxu0 }
 0x24a   : > { %v902_v53 = vadd.f32 %v901_v49, %v868_v51 }
 0x24c   : > { %v2998_v56 = vmax.f32 %v902_v53, 0.0 }
 0x251   : > { %v904_v52 = vpop.f32.mrf.mxu0 }
 0x252   : > { %v905_v54 = vadd.f32 %v904_v52, %v873_v50 }
 0x254   : > { %v2996_v55 = vmax.f32 %v905_v54, 0.0 }
 0x256   : > { %2465 = vmatpush.msk.msrb.mxu1 %vm784_vm1, %v2996_v55  ;;  %2471 = vmatpush.msk.msrb.mxu0 %vm784_vm1, %v2996_v55 }
 0x258   : > { %948 = vmatpush.msrb.mxu1 %v2998_v56  ;;  %1034 = vmatpush.msrb.mxu0 %v2998_v56 }
 0x259   : > { %2466 = vmatmul.msk.f32.vlgmr.msrb.gmra.mxu1 %vm777_vm2, %v910_v57  ;;  %2472 = vmatmul.msk.f32.vlgmr.msrb.gmra.mxu0 %vm777_vm2, %v999_v61 }
 0x25a   : > { %2468 = vmatpush.msk.msra.mxu1 %vm784_vm1, %v2996_v55 }
 0x25c   : > { %991 = vmatpush.msra.mxu1 %v2998_v56 }
 0x261   : > { %2467 = vmatmul.msk.f32.gmra.mxu1 %vm777_vm2, %v911_v58  ;;  %2473 = vmatmul.msk.f32.gmra.mxu0 %vm777_vm2, %v1000_v2 }
 0x269   : > { %2469 = vmatmul.msk.f32.vlgmr.msra.gmra.mxu1 %vm777_vm2, %v956_v59 }
 0x271   : > { %2470 = vmatmul.msk.f32.gmra.mxu1 %vm777_vm2, %v957_v60 }
 0x2d6   : > { %v950_v63 = vpop.f32.mrf.mxu1  ;;  %v3042_v21 = vpop.f32.mrf.mxu0 }
 0x2d7   : > { %v951_v0 = vadd.f32 %v950_v63, %v917_v62 }
 0x2d9   : > { %v1042_v1 = vmul.f32 0.28867513, %v951_v0 }
 0x2db   : > { %1044 = vxpose.xlu0.b32.start [1/2] (short) (narrow) %v1042_v1, 64 }
 0x2de   : > { %v953_v4 = vpop.f32.mrf.mxu1  ;;  %v3044_v22 = vpop.f32.mrf.mxu0 }
 0x2df   : > { %v954_v5 = vadd.f32 %v953_v4, %v922_v3 }
 0x2e1   : > { %v1043_v6 = vmul.f32 0.28867513, %v954_v5 }
 0x2e3   : > { %1045 = vxpose.xlu0.b32.end [2/2] (short) (narrow) %v1043_v6, 64 }
 0x2e6   : > { %v993_v7 = vpop.f32.mrf.mxu1 }
 0x2e7   : > { %v994_v12 = vadd.f32 %v993_v7, %v963_v11 }
 0x2ee   : > { %v996_v9 = vpop.f32.mrf.mxu1 }
 0x2ef   : > { %v997_v10 = vadd.f32 %v996_v9, %v968_v8 }
 0x2f1   : > { %2474 = vmatpush.msk.msra.mxu0 %vm784_vm1, %v997_v10 }
 0x2f3   : > { %1118 = vmatpush.msra.mxu0 %v994_v12 }
 0x37f   : > { %v1060_v13 = vpop.trf.xlu0 }
 0x380   : > { %2475 = vmatmul.msk.f32.vlgmr.msra.gmra.mxu0 %vm777_vm2, %v1060_v13 }
 0x387   : > { %v1061_v14 = vpop.trf.xlu0 }
 0x388   : > { %2476 = vmatmul.msk.f32.gmra.mxu0 %vm777_vm2, %v1061_v14 }
 0x38f   : > { %v1062_v15 = vpop.trf.xlu0 }
 0x390   : > { %2477 = vmatmul.msk.f32.gmra.mxu0 %vm777_vm2, %v1062_v15 }
 0x397   : > { %v1063_v16 = vpop.trf.xlu0 }
 0x398   : > { %2478 = vmatmul.msk.f32.gmra.mxu0 %vm777_vm2, %v1063_v16 }
 0x39f   : > { %v1064_v17 = vpop.trf.xlu0 }
 0x3a0   : > { %2479 = vmatmul.msk.f32.gmra.mxu0 %vm777_vm2, %v1064_v17  ;;  %v1002_v17 = vld [vmem:[%s3699_s14 + $0x8] sm:$0xf] }
 0x3a7   : > { %v1065_v18 = vpop.trf.xlu0 }
 0x3a8   : > { %2480 = vmatmul.msk.f32.gmra.mxu0 %vm777_vm2, %v1065_v18  ;;  %v1308_v18 = vld [vmem:[%s3702_s17] sm:$0xf] }
 0x3af   : > { %v1066_v19 = vpop.trf.xlu0 }
 0x3b0   : > { %2481 = vmatmul.msk.f32.gmra.mxu0 %vm777_vm2, %v1066_v19  ;;  %v1001_v19 = vld [vmem:[%s3699_s14] sm:$0xff] }
 0x3b7   : > { %v1067_v20 = vpop.trf.xlu0 }
 0x3b8   : > { %2482 = vmatmul.msk.f32.gmra.mxu0 %vm777_vm2, %v1067_v20 }
 0x3fd   : > { %v1120_v23 = vpop.f32.mrf.mxu0 }
 0x3fe   : > { %v1145_v37 = vsel %vm1144_vm3, %v1120_v23, -inf }
 0x405   : > { %v1123_v24 = vpop.f32.mrf.mxu0 }
 0x406   : > { %v1148_v38 = vsel %vm1144_vm3, %v1123_v24, -inf }
 0x40d   : > { %v1126_v25 = vpop.f32.mrf.mxu0 }
 0x40e   : > { %v1151_v35 = vsel %vm1144_vm3, %v1126_v25, -inf }
 0x415   : > { %v1129_v26 = vpop.f32.mrf.mxu0 }
 0x416   : > { %v1154_v36 = vsel %vm1144_vm3, %v1129_v26, -inf }
 0x41d   : > { %v1132_v27 = vpop.f32.mrf.mxu0 }
 0x41e   : > { %v1157_v28 = vsel %vm1144_vm3, %v1132_v27, -inf }
 0x41f   : > { %1158 = vmax.xlane.f32.xlu0 %v1157_v28 }
 0x425   : > { %v1135_v29 = vpop.f32.mrf.mxu0 }
 0x426   : > { %v1160_v33 = vsel %vm1144_vm3, %v1135_v29, -inf }
 0x42d   : > { %v1138_v30 = vpop.f32.mrf.mxu0 }
 0x42e   : > { %v1163_v31 = vsel %vm1144_vm3, %v1138_v30, -inf }
 0x42f   : > { %1164 = vmax.xlane.f32.xlu2 %v1163_v31 }
 0x435   : > { %v1141_v32 = vpop.f32.mrf.mxu0 }
 0x436   : > { %v1166_v34 = vsel %vm1144_vm3, %v1141_v32, -inf }
 0x437   : > { %1161 = vmax.xlane.f32.xlu2 %v1160_v33  ;;  %1167 = vmax.xlane.f32.xlu1 %v1166_v34 }
 0x43f   : > { %1152 = vmax.xlane.f32.xlu2 %v1151_v35  ;;  %1155 = vmax.xlane.f32.xlu1 %v1154_v36 }
 0x447   : > { %1146 = vmax.xlane.f32.xlu2 %v1145_v37  ;;  %1149 = vmax.xlane.f32.xlu1 %v1148_v38 }
 0x492   : > { %v1159_v39 = vpop.xlane.xlu0 %1158 }
 0x493   : > { %v1173_v42 = vsub.f32 %v1132_v27, %v1159_v39 }
 0x495   : > { %v1185_v44 = vmul.f32 1.442695, %v1173_v42 }
 0x4a2   : > { %v1165_v40 = vpop.xlane.xlu2 %1164 }
 0x4a3   : > { %v1175_v41 = vsub.f32 %v1138_v30, %v1165_v40 }
 0x4a5   : > { %v1189_v43 = vmul.f32 1.442695, %v1175_v41 }
 0x4a7   : > { %2601 = vpow2.f32 %v1189_v43 }
 0x4a8   : > { %2603 = vpow2.f32 %v1185_v44 }
 0x4aa   : > { %v1162_v45 = vpop.xlane.xlu2 %1161  ;;  %v1168_v46 = vpop.xlane.xlu1 %1167 }
 0x4ab   : > { %v1174_v47 = vsub.f32 %v1135_v29, %v1162_v45  ;;  %v1176_v7 = vsub.f32 %v1141_v32, %v1168_v46 }
 0x4ad   : > { %v3054_v48 = vpop.eup %2601  ;;  %v1187_v49 = vmul.f32 1.442695, %v1174_v47  ;;  %v1191_v10 = vmul.f32 1.442695, %v1176_v7 }
 0x4ae   : > { %v1211_v50 = vsel %vm1144_vm3, %v3054_v48, 0.0  ;;  %v3058_v53 = vpop.eup %2603 }
 0x4af   : > { %2605 = vpow2.f32 %v1187_v49  ;;  %1212 = vadd.xlane.f32.xlu2 %v1211_v50  ;;  %v1205_v62 = vsel %vm1144_vm3, %v3058_v53, 0.0  ;;  %v1286_v50 = vstv %s909_s29 }
 0x4b2   : > { %v1153_v51 = vpop.xlane.xlu2 %1152  ;;  %v1156_v52 = vpop.xlane.xlu1 %1155 }
 0x4b3   : > { %v1171_v54 = vsub.f32 %v1126_v25, %v1153_v51  ;;  %v1172_v57 = vsub.f32 %v1129_v26, %v1156_v52 }
 0x4b5   : > { %v2606_v58 = vpop.eup %2605  ;;  %v1181_v59 = vmul.f32 1.442695, %v1171_v54  ;;  %v1183_v60 = vmul.f32 1.442695, %v1172_v57 }
 0x4b6   : > { %v1208_v61 = vsel %vm1144_vm3, %v2606_v58, 0.0 }
 0x4b7   : > { %2607 = vpow2.f32 %v1181_v59  ;;  %1209 = vadd.xlane.f32.xlu1 %v1208_v61  ;;  %1206 = vadd.xlane.f32.xlu2 %v1205_v62  ;;  %v1307_v61 = vld [vmem:[%s3701_s16] sm:$0xf] }
 0x4b8   : > { %2609 = vpow2.f32 %v1183_v60 }
 0x4ba   : > { %v1147_v63 = vpop.xlane.xlu2 %1146  ;;  %v1150_v0 = vpop.xlane.xlu1 %1149 }
 0x4bb   : > { %v1169_v1 = vsub.f32 %v1120_v23, %v1147_v63  ;;  %v1170_v2 = vsub.f32 %v1123_v24, %v1150_v0  ;;  %v1366_v0 = vld [vmem:[%s3703_s18] sm:$0xf] }
 0x4bd   : > { %v2608_v3 = vpop.eup %2607  ;;  %v1177_v4 = vmul.f32 1.442695, %v1169_v1  ;;  %v1179_v5 = vmul.f32 1.442695, %v1170_v2 }
 0x4be   : > { %v2610_v6 = vpop.eup %2609  ;;  %v1199_v8 = vsel %vm1144_vm3, %v2608_v3, 0.0 }
 0x4bf   : > { %2611 = vpow2.f32 %v1177_v4  ;;  %v1202_v9 = vsel %vm1144_vm3, %v2610_v6, 0.0  ;;  %1200 = vadd.xlane.f32.xlu2 %v1199_v8 }
 0x4c0   : > { %2613 = vpow2.f32 %v1179_v5  ;;  %1203 = vadd.xlane.f32.xlu1 %v1202_v9  ;;  %v1423_v5 = vld [vmem:[%s3705_s20] sm:$0xf] }
 0x4c1   : > { %2615 = vpow2.f32 %v1191_v10 }
 0x4c5   : > { %v2612_v11 = vpop.eup %2611 }
 0x4c6   : > { %v2614_v12 = vpop.eup %2613  ;;  %v1193_v13 = vsel %vm1144_vm3, %v2612_v11, 0.0 }
 0x4c7   : > { %v1196_v14 = vsel %vm1144_vm3, %v2614_v12, 0.0  ;;  %1194 = vadd.xlane.f32.xlu2 %v1193_v13  ;;  %v2616_v15 = vpop.eup %2615 }
 0x4c8   : > { %1197 = vadd.xlane.f32.xlu1 %v1196_v14  ;;  %v1214_v16 = vsel %vm1144_vm3, %v2616_v15, 0.0 }
 0x4d0   : > { %1215 = vadd.xlane.f32.xlu1 %v1214_v16 }
 0x4df   : > { %1010 = vperm.xlu2 %2600, %v1002_v17  }
 0x4e7   : > { %1311 = vperm.xlu2 %2600, %v1308_v18  }
 0x4e9   : > { %1005 = vperm.xlu1 %2599, %v1001_v19  }
 0x522   : > { %v1213_v25 = vpop.xlane.xlu2 %1212 }
 0x52a   : > { %v1210_v20 = vpop.xlane.xlu1 %1209  ;;  %v1207_v27 = vpop.xlane.xlu2 %1206 }
 0x532   : > { %v1201_v33 = vpop.xlane.xlu2 %1200 }
 0x533   : > { %v1204_v23 = vpop.xlane.xlu1 %1203 }
 0x53a   : > { %v1195_v38 = vpop.xlane.xlu2 %1194 }
 0x53b   : > { %v1198_v24 = vpop.xlane.xlu1 %1197 }
 0x543   : > { %v1216_v26 = vpop.xlane.xlu1 %1215 }
 0x544   : > { %2617 = vrcp.f32 %v1216_v26 }
 0x545   : > { %2619 = vrcp.f32 %v1213_v25 }
 0x546   : > { %2621 = vrcp.f32 %v1210_v20 }
 0x547   : > { %2623 = vrcp.f32 %v1207_v27 }
 0x548   : > { %2625 = vrcp.f32 %v1204_v23 }
 0x549   : > { %2627 = vrcp.f32 %v1201_v33 }
 0x54a   : > { %v2618_v28 = vpop.eup %2617  ;;  %2629 = vrcp.f32 %v1198_v24 }
 0x54b   : > { %v1232_v29 = vmul.f32 %v2618_v28, %v2616_v15  ;;  %v2620_v30 = vpop.eup %2619  ;;  %2631 = vrcp.f32 %v1195_v38 }
 0x54c   : > { %v1231_v31 = vmul.f32 %v2620_v30, %v3054_v48  ;;  %v2622_v32 = vpop.eup %2621  ;;  %v1011_v48 = vpop.permute.xlu2 %1010 }
 0x54d   : > { %2483 = vmatpush.xpose.msk.msrb.mxu1 %vm1144_vm3, %v1232_v29  ;;  %v1230_v34 = vmul.f32 %v2622_v32, %v2606_v58  ;;  %v2624_v35 = vpop.eup %2623  ;;  %v1040_v49 = vadd.f32 %v3044_v22, %v1011_v48 }
 0x54e   : > { %v1229_v36 = vmul.f32 %v2624_v35, %v3058_v53  ;;  %v2626_v37 = vpop.eup %2625 }
 0x54f   : > { %v1228_v39 = vmul.f32 %v2626_v37, %v2610_v6  ;;  %v2628_v40 = vpop.eup %2627 }
 0x550   : > { %v1227_v41 = vmul.f32 %v2628_v40, %v2608_v3  ;;  %v2630_v42 = vpop.eup %2629 }
 0x551   : > { %2484 = vmatpush.xpose.msk.msrb.mxu1 %vm1144_vm3, %v1231_v31  ;;  %v1226_v43 = vmul.f32 %v2630_v42, %v2614_v12  ;;  %v2632_v44 = vpop.eup %2631 }
 0x552   : > { %v1225_v46 = vmul.f32 %v2632_v44, %v2612_v11 }
 0x554   : > { %v1312_v6 = vpop.permute.xlu2 %1311 }
 0x555   : > { %2485 = vmatpush.xpose.msk.msrb.mxu1 %vm1144_vm3, %v1230_v34 }
 0x559   : > { %2486 = vmatpush.xpose.msk.msrb.mxu1 %vm1144_vm3, %v1229_v36 }
 0x55b   : > { %v1006_v45 = vpop.permute.xlu1 %1005 }
 0x55c   : > { %v1037_v47 = vadd.f32 %v3042_v21, %v1006_v45 }
 0x55d   : > { %2487 = vmatpush.xpose.msk.msrb.mxu1 %vm1144_vm3, %v1228_v39 }
 0x561   : > { %2488 = vmatpush.xpose.msk.msrb.mxu1 %vm1144_vm3, %v1227_v41 }
 0x565   : > { %2489 = vmatpush.xpose.msk.msrb.mxu1 %vm1144_vm3, %v1226_v43 }
 0x569   : > { %2490 = vmatpush.xpose.msk.msrb.mxu1 %vm1144_vm3, %v1225_v46 }
 0x56c   : > { %2491 = vmatmul.msk.f32.vlgmr.msrb.gmra.mxu1 %vm1144_vm3, %v1037_v47 }
 0x574   : > { %2492 = vmatmul.msk.f32.gmra.mxu1 %vm1144_vm3, %v1040_v49 }
 0x5e9   : > { %v1280_v51 = vpop.f32.mrf.mxu1 }
 0x5ea   : > { %v1287_v52 = vmul.f32 %v1286_v50, %v1280_v51 }
 0x5ec   : > { %v1289_v53 = vadd.f32 %v1287_v52, %v2998_v56  ;;  %v1367_v56 = vld [vmem:[%s3704_s19] sm:$0xf] }
 0x5ee   : > { %1291 = vst.msk [vmem:[#allocation2] sm:$0xff] %vm1144_vm3, %v1289_v53 }
 0x5f1   : > { %v1283_v54 = vpop.f32.mrf.mxu1 }
 0x5f2   : > { %v1288_v57 = vmul.f32 %v1286_v50, %v1283_v54 }
 0x5f4   : > { %v1290_v21 = vadd.f32 %v1288_v57, %v2996_v55 }
 0x5f5   : > { %v1296_v58 = vld [vmem:[#allocation2 + $0x4] sm:$0xf]  ;;  %v1294_v59 = vld [vmem:[#allocation2] sm:$0xf] }
 0x5f6   : > { %1293 = vst.msk [vmem:[#allocation2 + $0x8] sm:$0xf] %vm1292_vm4, %v1290_v21  ;;  %1298 = vrot.lane.b32.xlu1 %v1296_v58, %s2786_s0 }
 0x5f7   : > { %1295 = vst.msk [vmem:[#allocation3] sm:$0xf] %vm1292_vm4, %v1294_v59 }
 0x5fd   : > { %v1303_v22 = vld [vmem:[#allocation2 + $0x8] sm:$0xf] }
 0x5fe   : > { %1304 = vst.msk [vmem:[#allocation3 + $0x4] sm:$0xf] %vm1292_vm4, %v1303_v22  ;;  %1370 = vperm.xlu1 %2599, %v1367_v56  }
 0x668   : > { %v1299_v60 = vpop.permute.xlu1 %1298 }
 0x669   : > { %1302 = vst.msk [vmem:[#allocation3] sm:$0xf] %vm1301_vm5, %v1299_v60 }
 0x670   : > { %v3101_v55 = vld [vmem:[#allocation3] sm:$0xff]  ;;  %v1371_v13 = vpop.permute.xlu1 %1370 }
 0x671   : > { %3738 = vst [vmem:[#allocation7_spill] sm:$0xff] %v3101_v55 }
 0x672   : > { %1315 = vst [vmem:[#allocation1] ss:$2 sm:$0xff] %v3101_v55 }
 0x679   : > { %v1316_v62 = vld.sshfl [vmem:[#allocation1] sm:$0xff pattern:$0x75316420]  ;;  %v1317_v63 = vld.sshfl [vmem:[#allocation1 + $0x8] sm:$0xff pattern:$0x75316420] }
 0x67a   : > { %2493 = vmatpush.msk.msra.mxu1 %vm784_vm1, %v1316_v62  ;;  %2495 = vmatpush.msk.msra.mxu3 %vm784_vm1, %v1317_v63  ;;  %1373 = vst [vmem:[#allocation1] ss:$2 sm:$0xff] %v3101_v55 }
 0x67b   : > { %2494 = vmatmul.msk.f32.vlgmr.msra.gmra.mxu1 %vm1318_vm6, %v1307_v61  ;;  %2496 = vmatmul.msk.f32.vlgmr.msra.gmra.mxu3 %vm1318_vm6, %v1307_v61 }
 0x681   : > { %v1374_v1 = vld.sshfl [vmem:[#allocation1] sm:$0xff pattern:$0x75316420]  ;;  %v1375_v2 = vld.sshfl [vmem:[#allocation1 + $0x8] sm:$0xff pattern:$0x75316420] }
 0x682   : > { %2497 = vmatpush.msk.msra.mxu2 %vm784_vm1, %v1374_v1  ;;  %2499 = vmatpush.msk.msrb.mxu3 %vm784_vm1, %v1375_v2  ;;  %1430 = vst [vmem:[#allocation1] ss:$2 sm:$0xff] %v3101_v55 }
 0x683   : > { %2498 = vmatmul.msk.f32.vlgmr.msra.gmra.mxu2 %vm1318_vm6, %v1366_v0  ;;  %2500 = vmatmul.msk.f32.vlgmr.msrb.gmra.mxu3 %vm1318_vm6, %v1366_v0 }
 0x689   : > { %v1431_v3 = vld.sshfl [vmem:[#allocation1] sm:$0xff pattern:$0x75316420]  ;;  %v1432_v4 = vld.sshfl [vmem:[#allocation1 + $0x8] sm:$0xff pattern:$0x75316420] }
 0x68a   : > { %2501 = vmatpush.msk.msrb.mxu2 %vm784_vm1, %v1431_v3  ;;  %2503 = vmatpush.msk.msra.mxu3 %vm784_vm1, %v1432_v4 }
 0x68b   : > { %2502 = vmatmul.msk.f32.vlgmr.msrb.gmra.mxu2 %vm1318_vm6, %v1423_v5  ;;  %2504 = vmatmul.msk.f32.vlgmr.msra.gmra.mxu3 %vm1318_vm6, %v1423_v5 }
 0x6f8   : > { %v1343_v7 = vpop.f32.mrf.mxu1 }
 0x6f9   : > { %v1344_v8 = vadd.f32 %v1343_v7, %v1312_v6 }
 0x6fb   : > { %v1480_v9 = vmul.f32 0.5, %v1344_v8 }
 0x6fd   : > { %1482 = vxpose.xlu2.b32.start.end [1/1] (short) %v1480_v9, 128 }
 0x6fe   : > { %v1363_v10 = vpop.f32.mrf.mxu3 }
 0x6ff   : > { %v1364_v11 = vadd.f32 %v1363_v10, %v1312_v6 }
 0x701   : > { %v1481_v12 = vmul.f32 0.5, %v1364_v11 }
 0x703   : > { %1514 = vxpose.xlu1.b32.start.end [1/1] (short) (narrow) %v1481_v12, 64 }
 0x706   : > { %v1400_v14 = vpop.f32.mrf.mxu2  ;;  %v1420_v15 = vpop.f32.mrf.mxu3 }
 0x707   : > { %v1401_v16 = vadd.f32 %v1400_v14, %v1371_v13  ;;  %v1421_v17 = vadd.f32 %v1420_v15, %v1371_v13 }
 0x709   : > { %2505 = vmatpush.msk.msra.mxu2 %vm784_vm1, %v1401_v16  ;;  %2530 = vmatpush.msk.msrb.mxu3 %vm784_vm1, %v1421_v17 }
 0x70e   : > { %v3161_v37 = vpop.f32.mrf.mxu2  ;;  %v3163_v38 = vpop.f32.mrf.mxu3 }
 0x70f   : > { %3739 = vst [vmem:[#allocation8_spill] sm:$0xff] %v3161_v37 }
 0x710   : > { %3740 = vst [vmem:[#allocation9_spill] sm:$0xff] %v3163_v38 }
 0x796   : > { %v1498_v18 = vpop.trf.xlu2 }
 0x797   : > { %2506 = vmatmul.msk.f32.vlgmr.msra.gmra.mxu2 %vm1318_vm6, %v1498_v18  ;;  %2531 = vmatmul.msk.f32.vlgmr.msrb.gmra.mxu3 %vm1318_vm6, %v1498_v18 }
 0x79e   : > { %v1499_v19 = vpop.trf.xlu2 }
 0x79f   : > { %2507 = vmatmul.msk.f32.gmra.mxu2 %vm1318_vm6, %v1499_v19  ;;  %2532 = vmatmul.msk.f32.gmra.mxu3 %vm1318_vm6, %v1499_v19 }
 0x7a6   : > { %v1500_v20 = vpop.trf.xlu2 }
 0x7a7   : > { %2508 = vmatmul.msk.f32.gmra.mxu2 %vm1318_vm6, %v1500_v20  ;;  %2533 = vmatmul.msk.f32.gmra.mxu3 %vm1318_vm6, %v1500_v20  ;;  %v1530_v36 = vpop.trf.xlu1 }
 0x7ae   : > { %v1501_v23 = vpop.trf.xlu2 }
 0x7af   : > { %2509 = vmatmul.msk.f32.gmra.mxu2 %vm1318_vm6, %v1501_v23  ;;  %2534 = vmatmul.msk.f32.gmra.mxu3 %vm1318_vm6, %v1501_v23  ;;  %v1531_v39 = vpop.trf.xlu1 }
 0x7b6   : > { %v1502_v24 = vpop.trf.xlu2 }
 0x7b7   : > { %2510 = vmatmul.msk.f32.gmra.mxu2 %vm1318_vm6, %v1502_v24  ;;  %2535 = vmatmul.msk.f32.gmra.mxu3 %vm1318_vm6, %v1502_v24  ;;  %v1532_v44 = vpop.trf.xlu1 }
 0x7be   : > { %v1503_v25 = vpop.trf.xlu2 }
 0x7bf   : > { %2511 = vmatmul.msk.f32.gmra.mxu2 %vm1318_vm6, %v1503_v25  ;;  %2536 = vmatmul.msk.f32.gmra.mxu3 %vm1318_vm6, %v1503_v25  ;;  %v1533_v53 = vpop.trf.xlu1 }
 0x7c6   : > { %v1504_v26 = vpop.trf.xlu2 }
 0x7c7   : > { %2512 = vmatmul.msk.f32.gmra.mxu2 %vm1318_vm6, %v1504_v26  ;;  %2537 = vmatmul.msk.f32.gmra.mxu3 %vm1318_vm6, %v1504_v26  ;;  %v1534_v21 = vpop.trf.xlu1 }
 0x7ce   : > { %v1505_v27 = vpop.trf.xlu2 }
 0x7cf   : > { %2513 = vmatmul.msk.f32.gmra.mxu2 %vm1318_vm6, %v1505_v27  ;;  %2538 = vmatmul.msk.f32.gmra.mxu3 %vm1318_vm6, %v1505_v27  ;;  %v1535_v56 = vpop.trf.xlu1 }
 0x7d6   : > { %v1506_v28 = vpop.trf.xlu2 }
 0x7d7   : > { %2514 = vmatmul.msk.f32.gmra.mxu2 %vm1318_vm6, %v1506_v28  ;;  %2539 = vmatmul.msk.f32.gmra.mxu3 %vm1318_vm6, %v1506_v28  ;;  %v1536_v61 = vpop.trf.xlu1 }
 0x7de   : > { %v1507_v29 = vpop.trf.xlu2 }
 0x7df   : > { %2515 = vmatmul.msk.f32.gmra.mxu2 %vm1318_vm6, %v1507_v29  ;;  %2540 = vmatmul.msk.f32.gmra.mxu3 %vm1318_vm6, %v1507_v29  ;;  %v1537_v0 = vpop.trf.xlu1 }
 0x7e6   : > { %v1508_v30 = vpop.trf.xlu2 }
 0x7e7   : > { %2516 = vmatmul.msk.f32.gmra.mxu2 %vm1318_vm6, %v1508_v30  ;;  %2541 = vmatmul.msk.f32.gmra.mxu3 %vm1318_vm6, %v1508_v30 }
 0x7ee   : > { %v1509_v31 = vpop.trf.xlu2 }
 0x7ef   : > { %2517 = vmatmul.msk.f32.gmra.mxu2 %vm1318_vm6, %v1509_v31  ;;  %2542 = vmatmul.msk.f32.gmra.mxu3 %vm1318_vm6, %v1509_v31 }
 0x7f6   : > { %v1510_v32 = vpop.trf.xlu2 }
 0x7f7   : > { %2518 = vmatmul.msk.f32.gmra.mxu2 %vm1318_vm6, %v1510_v32  ;;  %2543 = vmatmul.msk.f32.gmra.mxu3 %vm1318_vm6, %v1510_v32 }
 0x7fe   : > { %v1511_v33 = vpop.trf.xlu2 }
 0x7ff   : > { %2519 = vmatmul.msk.f32.gmra.mxu2 %vm1318_vm6, %v1511_v33  ;;  %2544 = vmatmul.msk.f32.gmra.mxu3 %vm1318_vm6, %v1511_v33 }
 0x806   : > { %v1512_v34 = vpop.trf.xlu2 }
 0x807   : > { %2545 = vmatmul.msk.f32.gmra.mxu3 %vm1318_vm6, %v1512_v34  ;;  %2520 = vmatmul.msk.f32.gmra.mxu2 %vm1318_vm6, %v1512_v34 }
 0x80e   : > { %v1513_v35 = vpop.trf.xlu2 }
 0x80f   : > { %2546 = vmatmul.msk.f32.gmra.mxu3 %vm1318_vm6, %v1513_v35  ;;  %2521 = vmatmul.msk.f32.gmra.mxu2 %vm1318_vm6, %v1513_v35 }
 0x817   : > { %2547 = vmatmul.msk.f32.gmra.mxu3 %vm1318_vm6, %v1530_v36  ;;  %2522 = vmatmul.msk.f32.gmra.mxu2 %vm1318_vm6, %v1530_v36 }
 0x81a   : > { %v3167_v40 = vpop.f32.mrf.mxu2  ;;  %v3169_v41 = vpop.f32.mrf.mxu3 }
 0x81f   : > { %2548 = vmatmul.msk.f32.gmra.mxu3 %vm1318_vm6, %v1531_v39  ;;  %2523 = vmatmul.msk.f32.gmra.mxu2 %vm1318_vm6, %v1531_v39 }
 0x822   : > { %v3173_v42 = vpop.f32.mrf.mxu2  ;;  %v3175_v43 = vpop.f32.mrf.mxu3 }
 0x823   : > { %v1806_v17 = vsel %vm1144_vm3, %v3175_v43, -inf }
 0x824   : > { %v1807_v25 = vmax.f32 %v3173_v42, %v1806_v17 }
 0x827   : > { %2549 = vmatmul.msk.f32.gmra.mxu3 %vm1318_vm6, %v1532_v44  ;;  %2524 = vmatmul.msk.f32.gmra.mxu2 %vm1318_vm6, %v1532_v44 }
 0x82a   : > { %v3179_v45 = vpop.f32.mrf.mxu2  ;;  %v3181_v46 = vpop.f32.mrf.mxu3 }
 0x82f   : > { %2550 = vmatmul.msk.f32.gmra.mxu3 %vm1318_vm6, %v1533_v53  ;;  %2525 = vmatmul.msk.f32.gmra.mxu2 %vm1318_vm6, %v1533_v53 }
 0x832   : > { %v3183_v47 = vpop.f32.mrf.mxu2  ;;  %v3185_v48 = vpop.f32.mrf.mxu3 }
 0x837   : > { %2551 = vmatmul.msk.f32.gmra.mxu3 %vm1318_vm6, %v1534_v21  ;;  %2526 = vmatmul.msk.f32.gmra.mxu2 %vm1318_vm6, %v1534_v21 }
 0x83a   : > { %v3187_v49 = vpop.f32.mrf.mxu2  ;;  %v3189_v50 = vpop.f32.mrf.mxu3 }
 0x83f   : > { %2552 = vmatmul.msk.f32.gmra.mxu3 %vm1318_vm6, %v1535_v56  ;;  %2527 = vmatmul.msk.f32.gmra.mxu2 %vm1318_vm6, %v1535_v56 }
 0x842   : > { %v3191_v51 = vpop.f32.mrf.mxu2  ;;  %v3193_v52 = vpop.f32.mrf.mxu3 }
 0x847   : > { %2553 = vmatmul.msk.f32.gmra.mxu3 %vm1318_vm6, %v1536_v61  ;;  %2528 = vmatmul.msk.f32.gmra.mxu2 %vm1318_vm6, %v1536_v61 }
 0x84a   : > { %v3197_v54 = vpop.f32.mrf.mxu2  ;;  %v3199_v57 = vpop.f32.mrf.mxu3 }
 0x84f   : > { %2554 = vmatmul.msk.f32.gmra.mxu3 %vm1318_vm6, %v1537_v0  ;;  %2529 = vmatmul.msk.f32.gmra.mxu2 %vm1318_vm6, %v1537_v0 }
 0x852   : > { %v3203_v58 = vpop.f32.mrf.mxu2  ;;  %v3205_v59 = vpop.f32.mrf.mxu3 }
 0x85a   : > { %v3209_v22 = vpop.f32.mrf.mxu2  ;;  %v3211_v60 = vpop.f32.mrf.mxu3 }
 0x85b   : > { %v1834_v53 = vsel %vm1144_vm3, %v3211_v60, -inf }
 0x85c   : > { %v1835_v0 = vmax.f32 %v3209_v22, %v1834_v53 }
 0x862   : > { %v3215_v62 = vpop.f32.mrf.mxu2  ;;  %v3217_v63 = vpop.f32.mrf.mxu3 }
 0x863   : > { %v1838_v33 = vsel %vm1144_vm3, %v3217_v63, -inf }
 0x864   : > { %v1839_v39 = vmax.f32 %v3215_v62, %v1838_v33 }
 0x86a   : > { %v3221_v1 = vpop.f32.mrf.mxu2  ;;  %v3223_v2 = vpop.f32.mrf.mxu3 }
 0x86b   : > { %v1842_v27 = vsel %vm1144_vm3, %v3223_v2, -inf }
 0x86c   : > { %v1843_v31 = vmax.f32 %v3221_v1, %v1842_v27 }
 0x872   : > { %v3225_v3 = vpop.f32.mrf.mxu2  ;;  %v3227_v4 = vpop.f32.mrf.mxu3 }
 0x873   : > { %v1846_v18 = vsel %vm1144_vm3, %v3227_v4, -inf }
 0x874   : > { %v1847_v24 = vmax.f32 %v3225_v3, %v1846_v18  ;;  %v1818_v18 = vsel %vm1144_vm3, %v3189_v50, -inf }
 0x87a   : > { %v3229_v5 = vpop.f32.mrf.mxu2  ;;  %v3231_v6 = vpop.f32.mrf.mxu3 }
 0x87b   : > { %v1850_v11 = vsel %vm1144_vm3, %v3231_v6, -inf }
 0x87c   : > { %v1851_v15 = vmax.f32 %v3229_v5, %v1850_v11 }
 0x882   : > { %v3233_v7 = vpop.f32.mrf.mxu2  ;;  %v3235_v8 = vpop.f32.mrf.mxu3 }
 0x883   : > { %v1854_v9 = vsel %vm1144_vm3, %v3235_v8, -inf }
 0x884   : > { %v1855_v10 = vmax.f32 %v3233_v7, %v1854_v9 }
 0x886   : > { %1856 = vmax.xlane.f32.xlu0 %v1855_v10  ;;  %v1830_v10 = vsel %vm1144_vm3, %v3205_v59, -inf }
 0x887   : > { %v1831_v11 = vmax.f32 %v3203_v58, %v1830_v10 }
 0x88a   : > { %v3242_v12 = vpop.f32.mrf.mxu3  ;;  %v3244_v13 = vpop.f32.mrf.mxu2 }
 0x88b   : > { %v1858_v14 = vsel %vm1144_vm3, %v3242_v12, -inf }
 0x88c   : > { %v1859_v16 = vmax.f32 %v3244_v13, %v1858_v14  ;;  %v1826_v14 = vsel %vm1144_vm3, %v3199_v57, -inf }
 0x88e   : > { %1852 = vmax.xlane.f32.xlu0 %v1851_v15  ;;  %1860 = vmax.xlane.f32.xlu1 %v1859_v16  ;;  %v1827_v15 = vmax.f32 %v3197_v54, %v1826_v14  ;;  %v1822_v16 = vsel %vm1144_vm3, %v3193_v52, -inf }
 0x88f   : > { %v1823_v17 = vmax.f32 %v3191_v51, %v1822_v16 }
 0x892   : > { %v3254_v19 = vpop.f32.mrf.mxu3  ;;  %v3256_v20 = vpop.f32.mrf.mxu2 }
 0x893   : > { %v1862_v23 = vsel %vm1144_vm3, %v3254_v19, -inf }
 0x894   : > { %v1863_v26 = vmax.f32 %v3256_v20, %v1862_v23  ;;  %v1819_v23 = vmax.f32 %v3187_v49, %v1818_v18 }
 0x896   : > { %1848 = vmax.xlane.f32.xlu0 %v1847_v24  ;;  %1808 = vmax.xlane.f32.xlu1 %v1807_v25  ;;  %v1814_v24 = vsel %vm1144_vm3, %v3185_v48, -inf }
 0x897   : > { %1864 = vmax.xlane.f32.xlu2 %v1863_v26  ;;  %v1815_v25 = vmax.f32 %v3183_v47, %v1814_v24  ;;  %v1810_v26 = vsel %vm1144_vm3, %v3181_v46, -inf }
 0x898   : > { %v1811_v27 = vmax.f32 %v3179_v45, %v1810_v26 }
 0x89a   : > { %v3265_v28 = vpop.f32.mrf.mxu3  ;;  %v3267_v29 = vpop.f32.mrf.mxu2 }
 0x89b   : > { %v1866_v30 = vsel %vm1144_vm3, %v3265_v28, -inf }
 0x89c   : > { %v1867_v32 = vmax.f32 %v3267_v29, %v1866_v30 }
 0x89e   : > { %1844 = vmax.xlane.f32.xlu0 %v1843_v31  ;;  %1868 = vmax.xlane.f32.xlu1 %v1867_v32  ;;  %v1802_v32 = vsel %vm1144_vm3, %v3169_v41, -inf }
 0x89f   : > { %v1803_v33 = vmax.f32 %v3167_v40, %v1802_v32 }
 0x8a2   : > { %v3275_v34 = vpop.f32.mrf.mxu3  ;;  %v3277_v35 = vpop.f32.mrf.mxu2 }
 0x8a3   : > { %v1870_v36 = vsel %vm1144_vm3, %v3275_v34, -inf }
 0x8a4   : > { %v1871_v44 = vmax.f32 %v3277_v35, %v1870_v36 }
 0x8a6   : > { %1840 = vmax.xlane.f32.xlu0 %v1839_v39  ;;  %1872 = vmax.xlane.f32.xlu1 %v1871_v44 }
 0x8aa   : > { %v3285_v21 = vpop.f32.mrf.mxu3  ;;  %v3287_v56 = vpop.f32.mrf.mxu2 }
 0x8ab   : > { %v1874_v61 = vsel %vm1144_vm3, %v3285_v21, -inf }
 0x8ac   : > { %v1875_v9 = vmax.f32 %v3287_v56, %v1874_v61 }
 0x8ae   : > { %1836 = vmax.xlane.f32.xlu0 %v1835_v0  ;;  %1876 = vmax.xlane.f32.xlu1 %v1875_v9 }
 0x8b2   : > { %v3311_v30 = vpop.f32.mrf.mxu3  ;;  %v3313_v31 = vpop.f32.mrf.mxu2 }
 0x8b3   : > { %v1878_v39 = vsel %vm1144_vm3, %v3311_v30, -inf }
 0x8b4   : > { %v1879_v53 = vmax.f32 %v3313_v31, %v1878_v39 }
 0x8b6   : > { %1832 = vmax.xlane.f32.xlu0 %v1831_v11 }
 0x8ba   : > { %v3318_v36 = vpop.f32.mrf.mxu3  ;;  %v3322_v44 = vpop.f32.mrf.mxu2 }
 0x8bb   : > { %v1882_v61 = vsel %vm1144_vm3, %v3318_v36, -inf }
 0x8bc   : > { %v1883_v9 = vmax.f32 %v3322_v44, %v1882_v61 }
 0x8be   : > { %1828 = vmax.xlane.f32.xlu0 %v1827_v15 }
 0x8c2   : > { %v3327_v0 = vpop.f32.mrf.mxu3  ;;  %v3330_v10 = vpop.f32.mrf.mxu2 }
 0x8c3   : > { %v1886_v11 = vsel %vm1144_vm3, %v3327_v0, -inf }
 0x8c4   : > { %v1887_v15 = vmax.f32 %v3330_v10, %v1886_v11 }
 0x8c6   : > { %1824 = vmax.xlane.f32.xlu0 %v1823_v17 }
 0x8ca   : > { %v3335_v16 = vpop.f32.mrf.mxu3  ;;  %v3337_v17 = vpop.f32.mrf.mxu2 }
 0x8cb   : > { %v1890_v18 = vsel %vm1144_vm3, %v3335_v16, -inf }
 0x8cc   : > { %v1891_v32 = vmax.f32 %v3337_v17, %v1890_v18 }
 0x8ce   : > { %1820 = vmax.xlane.f32.xlu0 %v1819_v23 }
 0x8d2   : > { %v3346_v61 = vpop.f32.mrf.mxu3 }
 0x8d6   : > { %1816 = vmax.xlane.f32.xlu0 %v1815_v25 }
 0x8de   : > { %1812 = vmax.xlane.f32.xlu0 %v1811_v27 }
 0x8e6   : > { %1804 = vmax.xlane.f32.xlu0 %v1803_v33 }
 0x8ee   : > { %1880 = vmax.xlane.f32.xlu0 %v1879_v53 }
 0x8f6   : > { %1884 = vmax.xlane.f32.xlu0 %v1883_v9 }
 0x8f9   : > { %v1857_v14 = vpop.xlane.xlu0 %1856 }
 0x8fa   : > { %v1924_v18 = vsub.f32 %v3233_v7, %v1857_v14 }
 0x8fe   : > { %1888 = vmax.xlane.f32.xlu0 %v1887_v15  ;;  %v1894_v15 = vsel %vm1144_vm3, %v3346_v61, -inf }
 0x901   : > { %v1853_v23 = vpop.xlane.xlu0 %1852  ;;  %v1861_v24 = vpop.xlane.xlu1 %1860 }
 0x902   : > { %v1923_v25 = vsub.f32 %v3231_v6, %v1853_v23  ;;  %v1926_v26 = vsub.f32 %v3244_v13, %v1861_v24  ;;  %v1927_v27 = vsub.f32 %v3242_v12, %v1861_v24  ;;  %v1922_v33 = vsub.f32 %v3229_v5, %v1853_v23  ;;  %v3350_v6 = vpop.f32.mrf.mxu2 }
 0x903   : > { %v1925_v13 = vsub.f32 %v3235_v8, %v1857_v14  ;;  %v1895_v5 = vmax.f32 %v3350_v6, %v1894_v15 }
 0x904   : > { %v1996_v39 = vmul.f32 1.442695, %v1923_v25  ;;  %v2002_v53 = vmul.f32 1.442695, %v1926_v26  ;;  %v2004_v9 = vmul.f32 1.442695, %v1927_v27 }
 0x905   : > { %v1994_v11 = vmul.f32 1.442695, %v1922_v33  ;;  %v2000_v23 = vmul.f32 1.442695, %v1925_v13 }
 0x906   : > { %1892 = vmax.xlane.f32.xlu0 %v1891_v32  ;;  %2633 = vpow2.f32 %v1996_v39  ;;  %v1998_v32 = vmul.f32 1.442695, %v1924_v18 }
 0x907   : > { %2635 = vpow2.f32 %v2002_v53 }
 0x908   : > { %2637 = vpow2.f32 %v2004_v9 }
 0x909   : > { %v1849_v12 = vpop.xlane.xlu0 %1848  ;;  %2639 = vpow2.f32 %v1994_v11 }
 0x90a   : > { %v1865_v25 = vpop.xlane.xlu2 %1864  ;;  %2641 = vpow2.f32 %v2000_v23  ;;  %v1921_v55 = vsub.f32 %v3227_v4, %v1849_v12 }
 0x90b   : > { %v1929_v8 = vsub.f32 %v3254_v19, %v1865_v25  ;;  %2643 = vpow2.f32 %v1998_v32  ;;  %v1928_v15 = vsub.f32 %v3256_v20, %v1865_v25  ;;  %v1920_v25 = vsub.f32 %v3225_v3, %v1849_v12 }
 0x90c   : > { %v3355_v24 = vpop.eup %2633 }
 0x90d   : > { %v3357_v26 = vpop.eup %2635  ;;  %v2090_v53 = vsel %vm1144_vm3, %v3355_v24, 0.0  ;;  %v2008_v19 = vmul.f32 1.442695, %v1929_v8  ;;  %v1992_v8 = vmul.f32 1.442695, %v1921_v55 }
 0x90e   : > { %1896 = vmax.xlane.f32.xlu0 %v1895_v5  ;;  %v3359_v27 = vpop.eup %2637 }
 0x90f   : > { %v2098_v33 = vsel %vm1144_vm3, %v3359_v27, 0.0  ;;  %v3364_v39 = vpop.eup %2639 }
 0x910   : > { %v2099_v7 = vadd.f32 %v3357_v26, %v2098_v33  ;;  %v2091_v18 = vadd.f32 %v3364_v39, %v2090_v53  ;;  %v3373_v23 = vpop.eup %2641  ;;  %v2006_v33 = vmul.f32 1.442695, %v1928_v15 }
 0x911   : > { %v1845_v14 = vpop.xlane.xlu0 %1844  ;;  %v2094_v20 = vsel %vm1144_vm3, %v3373_v23, 0.0 }
 0x912   : > { %v1918_v9 = vsub.f32 %v3221_v1, %v1845_v14  ;;  %v1919_v11 = vsub.f32 %v3223_v2, %v1845_v14  ;;  %2100 = vadd.xlane.f32.xlu1 %v2099_v7  ;;  %v3376_v1 = vpop.eup %2643 }
 0x913   : > { %v2095_v7 = vadd.f32 %v3376_v1, %v2094_v20 }
 0x914   : > { %v1986_v13 = vmul.f32 1.442695, %v1918_v9  ;;  %v1988_v5 = vmul.f32 1.442695, %v1919_v11  ;;  %v1990_v9 = vmul.f32 1.442695, %v1920_v25 }
 0x916   : > { %2645 = vpow2.f32 %v1986_v13  ;;  %2092 = vadd.xlane.f32.xlu0 %v2091_v18 }
 0x917   : > { %2647 = vpow2.f32 %v1988_v5 }
 0x918   : > { %2649 = vpow2.f32 %v2008_v19 }
 0x919   : > { %v1841_v2 = vpop.xlane.xlu0 %1840  ;;  %2651 = vpow2.f32 %v2006_v33 }
 0x91a   : > { %2653 = vpow2.f32 %v1992_v8  ;;  %v1917_v3 = vsub.f32 %v3217_v63, %v1841_v2  ;;  %v1916_v5 = vsub.f32 %v3215_v62, %v1841_v2 }
 0x91b   : > { %2655 = vpow2.f32 %v1990_v9 }
 0x91c   : > { %v3381_v32 = vpop.eup %2645  ;;  %v1984_v18 = vmul.f32 1.442695, %v1917_v3  ;;  %v1982_v8 = vmul.f32 1.442695, %v1916_v5 }
 0x91d   : > { %v3384_v14 = vpop.eup %2647 }
 0x91e   : > { %v3386_v53 = vpop.eup %2649  ;;  %2096 = vadd.xlane.f32.xlu0 %v2095_v7  ;;  %v2082_v4 = vsel %vm1144_vm3, %v3384_v14, 0.0 }
 0x91f   : > { %v2083_v11 = vadd.f32 %v3381_v32, %v2082_v4  ;;  %v3392_v12 = vpop.eup %2651  ;;  %v2102_v15 = vsel %vm1144_vm3, %v3386_v53, 0.0 }
 0x920   : > { %v2103_v25 = vadd.f32 %v3392_v12, %v2102_v15  ;;  %v3400_v63 = vpop.eup %2653 }
 0x921   : > { %2084 = vadd.xlane.f32.xlu1 %v2083_v11  ;;  %v1837_v55 = vpop.xlane.xlu0 %1836  ;;  %v3402_v7 = vpop.eup %2655 }
 0x922   : > { %v1914_v19 = vsub.f32 %v3209_v22, %v1837_v55  ;;  %v1915_v13 = vsub.f32 %v3211_v60, %v1837_v55  ;;  %v2086_v60 = vsel %vm1144_vm3, %v3400_v63, 0.0 }
 0x923   : > { %v2087_v11 = vadd.f32 %v3402_v7, %v2086_v60 }
 0x924   : > { %v1978_v33 = vmul.f32 1.442695, %v1914_v19  ;;  %v1980_v20 = vmul.f32 1.442695, %v1915_v13 }
 0x926   : > { %2657 = vpow2.f32 %v1978_v33  ;;  %2104 = vadd.xlane.f32.xlu0 %v2103_v25 }
 0x927   : > { %2659 = vpow2.f32 %v1980_v20 }
 0x928   : > { %2661 = vpow2.f32 %v1984_v18 }
 0x929   : > { %v1833_v22 = vpop.xlane.xlu0 %1832  ;;  %2663 = vpow2.f32 %v1982_v8 }
 0x92a   : > { %v1913_v62 = vsub.f32 %v3205_v59, %v1833_v22  ;;  %v1912_v2 = vsub.f32 %v3203_v58, %v1833_v22 }
 0x92c   : > { %v3408_v4 = vpop.eup %2657  ;;  %v1976_v9 = vmul.f32 1.442695, %v1913_v62  ;;  %v1974_v19 = vmul.f32 1.442695, %v1912_v2 }
 0x92d   : > { %v3411_v3 = vpop.eup %2659 }
 0x92e   : > { %v3413_v55 = vpop.eup %2661  ;;  %2088 = vadd.xlane.f32.xlu0 %v2087_v11  ;;  %v2074_v15 = vsel %vm1144_vm3, %v3411_v3, 0.0  ;;  %2665 = vpow2.f32 %v1976_v9 }
 0x92f   : > { %v2075_v13 = vadd.f32 %v3408_v4, %v2074_v15  ;;  %v3418_v59 = vpop.eup %2663  ;;  %v2078_v5 = vsel %vm1144_vm3, %v3413_v55, 0.0  ;;  %2667 = vpow2.f32 %v1974_v19 }
 0x930   : > { %v2079_v8 = vadd.f32 %v3418_v59, %v2078_v5 }
 0x931   : > { %2076 = vadd.xlane.f32.xlu1 %v2075_v13  ;;  %v1829_v58 = vpop.xlane.xlu0 %1828 }
 0x932   : > { %v1910_v18 = vsub.f32 %v3197_v54, %v1829_v58  ;;  %v1911_v33 = vsub.f32 %v3199_v57, %v1829_v58 }
 0x934   : > { %v1970_v20 = vmul.f32 1.442695, %v1910_v18  ;;  %v1972_v25 = vmul.f32 1.442695, %v1911_v33  ;;  %v3425_v22 = vpop.eup %2665 }
 0x935   : > { %v3427_v60 = vpop.eup %2667  ;;  %v2070_v2 = vsel %vm1144_vm3, %v3425_v22, 0.0 }
 0x936   : > { %2669 = vpow2.f32 %v1970_v20  ;;  %2080 = vadd.xlane.f32.xlu0 %v2079_v8  ;;  %v2071_v19 = vadd.f32 %v3427_v60, %v2070_v2 }
 0x937   : > { %2671 = vpow2.f32 %v1972_v25 }
 0x939   : > { %v1825_v62 = vpop.xlane.xlu0 %1824 }
 0x93a   : > { %v1908_v54 = vsub.f32 %v3191_v51, %v1825_v62  ;;  %v1909_v57 = vsub.f32 %v3193_v52, %v1825_v62 }
 0x93c   : > { %v3433_v9 = vpop.eup %2669  ;;  %v1966_v11 = vmul.f32 1.442695, %v1908_v54  ;;  %v1968_v15 = vmul.f32 1.442695, %v1909_v57 }
 0x93d   : > { %v3436_v13 = vpop.eup %2671 }
 0x93e   : > { %3741 = vst [vmem:[#allocation10_spill] sm:$0xff] %v3436_v13  ;;  %2673 = vpow2.f32 %v1966_v11  ;;  %2072 = vadd.xlane.f32.xlu0 %v2071_v19  ;;  %v2066_v58 = vsel %vm1144_vm3, %v3436_v13, 0.0  ;;  %v1809_v19 = vpop.xlane.xlu1 %1808 }
 0x93f   : > { %2675 = vpow2.f32 %v1968_v15  ;;  %v2067_v5 = vadd.f32 %v3433_v9, %v2066_v58  ;;  %v1900_v38 = vsub.f32 %v3173_v42, %v1809_v19 }
 0x941   : > { %2068 = vadd.xlane.f32.xlu1 %v2067_v5  ;;  %v1821_v51 = vpop.xlane.xlu0 %1820 }
 0x942   : > { %v1906_v52 = vsub.f32 %v3187_v49, %v1821_v51  ;;  %v1907_v18 = vsub.f32 %v3189_v50, %v1821_v51 }
 0x944   : > { %v3443_v33 = vpop.eup %2673  ;;  %v1962_v20 = vmul.f32 1.442695, %v1906_v52  ;;  %v1964_v25 = vmul.f32 1.442695, %v1907_v18 }
 0x945   : > { %3742 = vst [vmem:[#allocation11_spill] sm:$0xff] %v3443_v33  ;;  %v3445_v8 = vpop.eup %2675 }
 0x946   : > { %3743 = vst [vmem:[#allocation12_spill] sm:$0xff] %v3445_v8  ;;  %2677 = vpow2.f32 %v1962_v20  ;;  %v2062_v62 = vsel %vm1144_vm3, %v3445_v8, 0.0  ;;  %v3463_v51 = vpop.xlane.xlu1 %1868 }
 0x947   : > { %2679 = vpow2.f32 %v1964_v25  ;;  %v2063_v2 = vadd.f32 %v3443_v33, %v2062_v62  ;;  %v1901_v25 = vsub.f32 %v3175_v43, %v1809_v19 }
 0x949   : > { %2064 = vadd.xlane.f32.xlu0 %v2063_v2  ;;  %v3450_v54 = vpop.xlane.xlu0 %1816  ;;  %v1952_v37 = vmul.f32 1.442695, %v1901_v25 }
 0x94c   : > { %v3452_v57 = vpop.eup %2677 }
 0x94d   : > { %3744 = vst [vmem:[#allocation13_spill] sm:$0xff] %v3452_v57  ;;  %v3454_v49 = vpop.eup %2679 }
 0x94e   : > { %3745 = vst [vmem:[#allocation14_spill] sm:$0xff] %v3454_v49  ;;  %v2058_v50 = vsel %vm1144_vm3, %v3454_v49, 0.0  ;;  %v3467_v18 = vpop.xlane.xlu1 %1872 }
 0x94f   : > { %v2059_v11 = vadd.f32 %v3452_v57, %v2058_v50  ;;  %v1950_v57 = vmul.f32 1.442695, %v1900_v38 }
 0x951   : > { %2060 = vadd.xlane.f32.xlu2 %v2059_v11  ;;  %v1813_v15 = vpop.xlane.xlu0 %1812 }
 0x952   : > { %v1902_v38 = vsub.f32 %v3179_v45, %v1813_v15 }
 0x956   : > { %v1877_v49 = vpop.xlane.xlu1 %1876 }
 0x957   : > { %v1935_v33 = vsub.f32 %v3285_v21, %v1877_v49 }
 0x959   : > { %v3459_v58 = vpop.xlane.xlu0 %1804 }
 0x961   : > { %v3461_v5 = vpop.xlane.xlu0 %1880 }
 0x969   : > { %v3465_v52 = vpop.xlane.xlu0 %1884 }
 0x971   : > { %v1889_v20 = vpop.xlane.xlu0 %1888 }
 0x972   : > { %v1940_v62 = vsub.f32 %v3330_v10, %v1889_v20  ;;  %v1941_v2 = vsub.f32 %v3327_v0, %v1889_v20  ;;  %v1903_v10 = vsub.f32 %v3181_v46, %v1813_v15  ;;  %v1934_v20 = vsub.f32 %v3287_v56, %v1877_v49 }
 0x973   : > { %v1954_v56 = vmul.f32 1.442695, %v1902_v38  ;;  %v1937_v49 = vsub.f32 %v3311_v30, %v3461_v5 }
 0x974   : > { %v2030_v50 = vmul.f32 1.442695, %v1940_v62  ;;  %v2032_v11 = vmul.f32 1.442695, %v1941_v2  ;;  %v1905_v2 = vsub.f32 %v3185_v48, %v3450_v54 }
 0x976   : > { %2681 = vpow2.f32 %v2030_v50 }
 0x977   : > { %2683 = vpow2.f32 %v2032_v11 }
 0x978   : > { %2685 = vpow2.f32 %v1952_v37  ;;  %v2020_v37 = vmul.f32 1.442695, %v1935_v33 }
 0x979   : > { %v1893_v8 = vpop.xlane.xlu0 %1892  ;;  %2687 = vpow2.f32 %v1950_v57 }
 0x97a   : > { %v1942_v13 = vsub.f32 %v3337_v17, %v1893_v8  ;;  %v1943_v43 = vsub.f32 %v3335_v16, %v1893_v8  ;;  %v1956_v17 = vmul.f32 1.442695, %v1903_v10  ;;  %v2018_v8 = vmul.f32 1.442695, %v1934_v20 }
 0x97b   : > { %v1904_v10 = vsub.f32 %v3183_v47, %v3450_v54  ;;  %v2024_v20 = vmul.f32 1.442695, %v1937_v49 }
 0x97c   : > { %v3477_v0 = vpop.eup %2681  ;;  %v2034_v42 = vmul.f32 1.442695, %v1942_v13  ;;  %v2036_v19 = vmul.f32 1.442695, %v1943_v43 }
 0x97d   : > { %v3480_v25 = vpop.eup %2683  ;;  %v1958_v54 = vmul.f32 1.442695, %v1904_v10 }
 0x97e   : > { %2689 = vpow2.f32 %v2034_v42  ;;  %v2126_v21 = vsel %vm1144_vm3, %v3480_v25, 0.0  ;;  %v3486_v16 = vpop.eup %2685 }
 0x97f   : > { %2691 = vpow2.f32 %v2036_v19  ;;  %v2127_v46 = vadd.f32 %v3477_v0, %v2126_v21  ;;  %v3490_v33 = vpop.eup %2687  ;;  %v2046_v15 = vsel %vm1144_vm3, %v3486_v16, 0.0  ;;  %v1960_v19 = vmul.f32 1.442695, %v1905_v2 }
 0x980   : > { %2693 = vpow2.f32 %v2020_v37  ;;  %v2047_v30 = vadd.f32 %v3490_v33, %v2046_v15  ;;  %v1933_v37 = vsub.f32 %v3275_v34, %v3467_v18  ;;  %v1932_v34 = vsub.f32 %v3277_v35, %v3467_v18 }
 0x981   : > { %2128 = vadd.xlane.f32.xlu2 %v2127_v46  ;;  %v1897_v13 = vpop.xlane.xlu0 %1896  ;;  %2695 = vpow2.f32 %v1956_v17  ;;  %v1938_v15 = vsub.f32 %v3322_v44, %v3465_v52 }
 0x982   : > { %v1944_v57 = vsub.f32 %v3350_v6, %v1897_v13  ;;  %v1945_v45 = vsub.f32 %v3346_v61, %v1897_v13  ;;  %2697 = vpow2.f32 %v2018_v8  ;;  %v1936_v61 = vsub.f32 %v3313_v31, %v3461_v5 }
 0x983   : > { %2699 = vpow2.f32 %v1954_v56  ;;  %v1939_v8 = vsub.f32 %v3318_v36, %v3465_v52 }
 0x984   : > { %v3496_v62 = vpop.eup %2689  ;;  %v2038_v50 = vmul.f32 1.442695, %v1944_v57  ;;  %v2040_v11 = vmul.f32 1.442695, %v1945_v45  ;;  %v2022_v21 = vmul.f32 1.442695, %v1936_v61 }
 0x985   : > { %v3500_v6 = vpop.eup %2691  ;;  %v2016_v57 = vmul.f32 1.442695, %v1933_v37  ;;  %v2014_v61 = vmul.f32 1.442695, %v1932_v34 }
 0x986   : > { %2701 = vpow2.f32 %v2038_v50  ;;  %v2130_v43 = vsel %vm1144_vm3, %v3500_v6, 0.0  ;;  %v3510_v42 = vpop.eup %2693  ;;  %v2028_v50 = vmul.f32 1.442695, %v1939_v8 }
 0x987   : > { %2703 = vpow2.f32 %v2040_v11  ;;  %v2131_v48 = vadd.f32 %v3496_v62, %v2130_v43  ;;  %v3512_v38 = vpop.eup %2695  ;;  %v2114_v17 = vsel %vm1144_vm3, %v3510_v42, 0.0  ;;  %v2026_v43 = vmul.f32 1.442695, %v1938_v15 }
 0x988   : > { %v3516_v5 = vpop.eup %2697  ;;  %2705 = vpow2.f32 %v2024_v20  ;;  %v2050_v56 = vsel %vm1144_vm3, %v3512_v38, 0.0 }
 0x989   : > { %2048 = vadd.xlane.f32.xlu2 %v2047_v30  ;;  %2132 = vadd.xlane.f32.xlu0 %v2131_v48  ;;  %v3514_v31 = vpop.xlane.xlu0 %2092  ;;  %v3520_v47 = vpop.eup %2699  ;;  %2707 = vpow2.f32 %v1960_v19  ;;  %v2115_v45 = vadd.f32 %v3516_v5, %v2114_v17  ;;  %v1899_v30 = vsub.f32 %v3169_v41, %v3459_v58  ;;  %v1898_v48 = vsub.f32 %v3167_v40, %v3459_v58 }
 0x98a   : > { %2709 = vpow2.f32 %v2022_v21  ;;  %v2051_v36 = vadd.f32 %v3520_v47, %v2050_v56  ;;  %v1931_v56 = vsub.f32 %v3265_v28, %v3463_v51 }
 0x98b   : > { %2711 = vpow2.f32 %v1958_v54  ;;  %v1948_v19 = vmul.f32 1.442695, %v1899_v30  ;;  %v2101_v54 = vpop.xlane.xlu1 %2100  ;;  %v1946_v34 = vmul.f32 1.442695, %v1898_v48 }
 0x98c   : > { %v3524_v46 = vpop.eup %2701  ;;  %2713 = vpow2.f32 %v2016_v57  ;;  %v2012_v15 = vmul.f32 1.442695, %v1931_v56 }
 0x98d   : > { %v3530_v13 = vpop.eup %2703  ;;  %2715 = vpow2.f32 %v2028_v50 }
 0x98e   : > { %v2134_v49 = vsel %vm1144_vm3, %v3530_v13, 0.0  ;;  %v3541_v11 = vpop.eup %2705  ;;  %2717 = vpow2.f32 %v2014_v61 }
 0x98f   : > { %v2135_v2 = vadd.f32 %v3524_v46, %v2134_v49  ;;  %v3543_v18 = vpop.eup %2707  ;;  %v2118_v52 = vsel %vm1144_vm3, %v3541_v11, 0.0  ;;  %2719 = vpow2.f32 %v2026_v43  ;;  %v1930_v49 = vsub.f32 %v3267_v29, %v3463_v51 }
 0x990   : > { %v3547_v44 = vpop.eup %2709  ;;  %v2054_v20 = vsel %vm1144_vm3, %v3543_v18, 0.0 }
 0x991   : > { %2116 = vadd.xlane.f32.xlu2 %v2115_v45  ;;  %2052 = vadd.xlane.f32.xlu0 %v2051_v36  ;;  %v2097_v35 = vpop.xlane.xlu0 %2096  ;;  %v3551_v10 = vpop.eup %2711  ;;  %v2119_v41 = vadd.f32 %v3547_v44, %v2118_v52 }
 0x992   : > { %2136 = vadd.xlane.f32.xlu1 %v2135_v2  ;;  %v2055_v37 = vadd.f32 %v3551_v10, %v2054_v20  ;;  %v3559_v21 = vpop.eup %2713  ;;  %v2010_v20 = vmul.f32 1.442695, %v1930_v49 }
 0x993   : > { %v3561_v8 = vpop.eup %2715  ;;  %v2110_v58 = vsel %vm1144_vm3, %v3559_v21, 0.0 }
 0x994   : > { %v3565_v40 = vpop.eup %2717  ;;  %v2122_v45 = vsel %vm1144_vm3, %v3561_v8, 0.0 }
 0x995   : > { %v3569_v57 = vpop.eup %2719  ;;  %v2111_v28 = vadd.f32 %v3565_v40, %v2110_v58 }
 0x996   : > { %v2123_v2 = vadd.f32 %v3569_v57, %v2122_v45 }
 0x999   : > { %2120 = vadd.xlane.f32.xlu0 %v2119_v41  ;;  %v2105_v17 = vpop.xlane.xlu0 %2104 }
 0x99a   : > { %2056 = vadd.xlane.f32.xlu1 %v2055_v37  ;;  %2721 = vrcp.f32 %v2105_v17 }
 0x99b   : > { %2723 = vpow2.f32 %v1948_v19 }
 0x99c   : > { %2725 = vrcp.f32 %v2101_v54 }
 0x99d   : > { %2727 = vpow2.f32 %v1946_v34 }
 0x99e   : > { %2729 = vrcp.f32 %v2097_v35 }
 0x99f   : > { %2731 = vpow2.f32 %v2012_v15 }
 0x9a0   : > { %v2722_v36 = vpop.eup %2721  ;;  %2733 = vrcp.f32 %v3514_v31 }
 0x9a1   : > { %v3577_v50 = vpop.eup %2723  ;;  %v2193_v61 = vmul.f32 %v2722_v36, %v3386_v53  ;;  %2112 = vadd.xlane.f32.xlu0 %v2111_v28  ;;  %v2089_v30 = vpop.xlane.xlu0 %2088  ;;  %v2192_v43 = vmul.f32 %v2722_v36, %v3392_v12  ;;  %v1424_v12 = vld [vmem:[%s3706_s21] sm:$0xf]  ;;  %2735 = vpow2.f32 %v2010_v20 }
 0x9a2   : > { %v2726_v52 = vpop.eup %2725  ;;  %2124 = vadd.xlane.f32.xlu1 %v2123_v2  ;;  %v2042_v53 = vsel %vm1144_vm3, %v3577_v50, 0.0  ;;  %2737 = vrcp.f32 %v2089_v30 }
 0x9a3   : > { %2285 = vmatpush.xpose.msrb.mxu0 %v2192_v43  ;;  %2555 = vmatpush.xpose.msk.msrb.mxu1 %vm1144_vm3, %v2193_v61  ;;  %v3583_v29 = vpop.eup %2727  ;;  %v2190_v51 = vmul.f32 %v2726_v52, %v3357_v26  ;;  %v2191_v35 = vmul.f32 %v2726_v52, %v3359_v27  ;;  %v2085_v26 = vpop.xlane.xlu1 %2084 }
 0x9a4   : > { %v2730_v48 = vpop.eup %2729  ;;  %v2043_v31 = vadd.f32 %v3583_v29, %v2042_v53  ;;  %2739 = vrcp.f32 %v2085_v26 }
 0x9a5   : > { %v3594_v19 = vpop.eup %2731  ;;  %v2188_v27 = vmul.f32 %v2730_v48, %v3376_v1  ;;  %v2189_v41 = vmul.f32 %v2730_v48, %v3373_v23  ;;  %v3747_v48 = vld [vmem:[#allocation11_spill] sm:$0xff] }
 0x9a6   : > { %v2734_v37 = vpop.eup %2733  ;;  %v2106_v58 = vsel %vm1144_vm3, %v3594_v19, 0.0 }
 0x9a7   : > { %2286 = vmatpush.xpose.msrb.mxu0 %v2190_v51  ;;  %2556 = vmatpush.xpose.msk.msrb.mxu1 %vm1144_vm3, %v2191_v35  ;;  %v3599_v17 = vpop.eup %2735  ;;  %v2186_v56 = vmul.f32 %v2734_v37, %v3364_v39  ;;  %v2187_v34 = vmul.f32 %v2734_v37, %v3355_v24 }
 0x9a8   : > { %v2738_v45 = vpop.eup %2737  ;;  %v2107_v23 = vadd.f32 %v3599_v17, %v2106_v58 }
 0x9a9   : > { %1427 = vperm.xlu2 %2600, %v1424_v12   ;;  %v2081_v54 = vpop.xlane.xlu0 %2080  ;;  %v2184_v49 = vmul.f32 %v2738_v45, %v3402_v7  ;;  %v2185_v15 = vmul.f32 %v2738_v45, %v3400_v63 }
 0x9aa   : > { %2044 = vadd.xlane.f32.xlu1 %v2043_v31  ;;  %2741 = vrcp.f32 %v2081_v54  ;;  %v2740_v28 = vpop.eup %2739  ;;  %v3748_v31 = vld [vmem:[#allocation12_spill] sm:$0xff] }
 0x9ab   : > { %2287 = vmatpush.xpose.msrb.mxu0 %v2188_v27  ;;  %2557 = vmatpush.xpose.msk.msrb.mxu1 %vm1144_vm3, %v2189_v41  ;;  %v2077_v1 = vpop.xlane.xlu1 %2076  ;;  %v2182_v39 = vmul.f32 %v2740_v28, %v3381_v32  ;;  %v2183_v36 = vmul.f32 %v2740_v28, %v3384_v14  ;;  %v3750_v41 = vld [vmem:[#allocation14_spill] sm:$0xff] }
 0x9ac   : > { %2743 = vrcp.f32 %v2077_v1 }
 0x9af   : > { %2288 = vmatpush.xpose.msrb.mxu0 %v2186_v56  ;;  %2558 = vmatpush.xpose.msk.msrb.mxu1 %vm1144_vm3, %v2187_v34 }
 0x9b0   : > { %v2742_v2 = vpop.eup %2741 }
 0x9b1   : > { %v2073_v24 = vpop.xlane.xlu0 %2072  ;;  %v2180_v7 = vmul.f32 %v2742_v2, %v3418_v59  ;;  %v2181_v63 = vmul.f32 %v2742_v2, %v3413_v55 }
 0x9b2   : > { %2108 = vadd.xlane.f32.xlu1 %v2107_v23  ;;  %2745 = vrcp.f32 %v2073_v24  ;;  %v2744_v30 = vpop.eup %2743 }
 0x9b3   : > { %2289 = vmatpush.xpose.msrb.mxu0 %v2184_v49  ;;  %2559 = vmatpush.xpose.msk.msrb.mxu1 %vm1144_vm3, %v2185_v15  ;;  %v2178_v32 = vmul.f32 %v2744_v30, %v3408_v4  ;;  %v2179_v14 = vmul.f32 %v2744_v30, %v3411_v3  ;;  %v3746_v4 = vld [vmem:[#allocation10_spill] sm:$0xff] }
 0x9b4   : > { %v2069_v61 = vpop.xlane.xlu1 %2068 }
 0x9b5   : > { %2747 = vrcp.f32 %v2069_v61 }
 0x9b7   : > { %2290 = vmatpush.xpose.msrb.mxu0 %v2182_v39  ;;  %2560 = vmatpush.xpose.msk.msrb.mxu1 %vm1144_vm3, %v2183_v36 }
 0x9b8   : > { %v2746_v52 = vpop.eup %2745 }
 0x9b9   : > { %v2176_v20 = vmul.f32 %v2746_v52, %v3427_v60  ;;  %v2177_v59 = vmul.f32 %v2746_v52, %v3425_v22  ;;  %v3749_v22 = vld [vmem:[#allocation13_spill] sm:$0xff] }
 0x9ba   : > { %v3752_v52 = vld [vmem:[#allocation9_spill] sm:$0xff] }
 0x9bb   : > { %2291 = vmatpush.xpose.msrb.mxu0 %v2180_v7  ;;  %2561 = vmatpush.xpose.msk.msrb.mxu1 %vm1144_vm3, %v2181_v63  ;;  %v2748_v55 = vpop.eup %2747 }
 0x9bc   : > { %v2065_v43 = vpop.xlane.xlu0 %2064  ;;  %v2174_v35 = vmul.f32 %v2748_v55, %v3433_v9  ;;  %v2175_v53 = vmul.f32 %v2748_v55, %v3746_v4 }
 0x9bd   : > { %2749 = vrcp.f32 %v2065_v43 }
 0x9bf   : > { %2292 = vmatpush.xpose.msrb.mxu0 %v2178_v32  ;;  %2562 = vmatpush.xpose.msk.msrb.mxu1 %vm1144_vm3, %v2179_v14 }
 0x9c3   : > { %2293 = vmatpush.xpose.msrb.mxu0 %v2176_v20  ;;  %2563 = vmatpush.xpose.msk.msrb.mxu1 %vm1144_vm3, %v2177_v59  ;;  %v2750_v3 = vpop.eup %2749 }
 0x9c4   : > { %v2061_v51 = vpop.xlane.xlu2 %2060  ;;  %v2172_v12 = vmul.f32 %v2750_v3, %v3747_v48  ;;  %v2173_v60 = vmul.f32 %v2750_v3, %v3748_v31 }
 0x9c5   : > { %2751 = vrcp.f32 %v2061_v51 }
 0x9c7   : > { %2294 = vmatpush.xpose.msrb.mxu0 %v2174_v35  ;;  %2564 = vmatpush.xpose.msk.msrb.mxu1 %vm1144_vm3, %v2175_v53 }
 0x9cb   : > { %v2752_v26 = vpop.eup %2751  ;;  %2295 = vmatpush.xpose.msrb.mxu0 %v2172_v12  ;;  %2565 = vmatpush.xpose.msk.msrb.mxu1 %vm1144_vm3, %v2173_v60 }
 0x9cc   : > { %v2170_v27 = vmul.f32 %v2752_v26, %v3749_v22  ;;  %v2171_v37 = vmul.f32 %v2752_v26, %v3750_v41 }
 0x9cf   : > { %2296 = vmatpush.xpose.msrb.mxu0 %v2170_v27  ;;  %2566 = vmatpush.xpose.msk.msrb.mxu1 %vm1144_vm3, %v2171_v37  ;;  %v2365_v27 = vstv %s1306_s26 }
 0x9f4   : > { %v2129_v56 = vpop.xlane.xlu2 %2128 }
 0x9fc   : > { %v2133_v9 = vpop.xlane.xlu0 %2132  ;;  %v2049_v45 = vpop.xlane.xlu2 %2048 }
 0xa04   : > { %v2053_v34 = vpop.xlane.xlu0 %2052  ;;  %v2117_v2 = vpop.xlane.xlu2 %2116 }
 0xa05   : > { %v2137_v54 = vpop.xlane.xlu1 %2136 }
 0xa0c   : > { %v2121_v59 = vpop.xlane.xlu0 %2120 }
 0xa0d   : > { %v2057_v58 = vpop.xlane.xlu1 %2056 }
 0xa0e   : > { %2753 = vrcp.f32 %v2057_v58 }
 0xa0f   : > { %2755 = vrcp.f32 %v2053_v34 }
 0xa10   : > { %2757 = vrcp.f32 %v2049_v45 }
 0xa11   : > { %2759 = vrcp.f32 %v2137_v54 }
 0xa14   : > { %v2754_v23 = vpop.eup %2753  ;;  %v2113_v35 = vpop.xlane.xlu0 %2112 }
 0xa15   : > { %v2125_v1 = vpop.xlane.xlu1 %2124  ;;  %v2168_v49 = vmul.f32 %v2754_v23, %v3551_v10  ;;  %v2169_v15 = vmul.f32 %v2754_v23, %v3543_v18  ;;  %v2756_v28 = vpop.eup %2755 }
 0xa16   : > { %v2166_v24 = vmul.f32 %v2756_v28, %v3520_v47  ;;  %v2167_v39 = vmul.f32 %v2756_v28, %v3512_v38  ;;  %v2758_v36 = vpop.eup %2757  ;;  %v1428_v38 = vpop.permute.xlu2 %1427 }
 0xa17   : > { %2297 = vmatpush.xpose.msrb.mxu0 %v2168_v49  ;;  %2567 = vmatpush.xpose.msk.msrb.mxu1 %vm1144_vm3, %v2169_v15  ;;  %v2164_v7 = vmul.f32 %v2758_v36, %v3490_v33  ;;  %v2165_v10 = vmul.f32 %v2758_v36, %v3486_v16  ;;  %v2760_v18 = vpop.eup %2759  ;;  %v3751_v16 = vld [vmem:[#allocation8_spill] sm:$0xff]  ;;  %v1478_v20 = vadd.f32 %v3752_v52, %v1428_v38 }
 0xa18   : > { %v2209_v43 = vmul.f32 %v2760_v18, %v3530_v13  ;;  %v2208_v32 = vmul.f32 %v2760_v18, %v3524_v46  ;;  %v1458_v14 = vadd.f32 %v3751_v16, %v1428_v38 }
 0xa1b   : > { %2298 = vmatpush.xpose.msrb.mxu0 %v2166_v24  ;;  %2568 = vmatpush.xpose.msk.msrb.mxu1 %vm1144_vm3, %v2167_v39 }
 0xa1d   : > { %v2045_v61 = vpop.xlane.xlu1 %2044 }
 0xa1e   : > { %2761 = vrcp.f32 %v2045_v61 }
 0xa1f   : > { %2299 = vmatpush.xpose.msrb.mxu0 %v2164_v7  ;;  %2569 = vmatpush.xpose.msk.msrb.mxu1 %vm1144_vm3, %v2165_v10  ;;  %2763 = vrcp.f32 %v2133_v9  ;;  %v3753_v9 = vld [vmem:[#allocation7_spill] sm:$0xff] }
 0xa20   : > { %2765 = vrcp.f32 %v2129_v56 }
 0xa21   : > { %2767 = vrcp.f32 %v2125_v1 }
 0xa22   : > { %2769 = vrcp.f32 %v2121_v59 }
 0xa23   : > { %2771 = vrcp.f32 %v2117_v2 }
 0xa24   : > { %v2762_v47 = vpop.eup %2761  ;;  %2773 = vrcp.f32 %v2113_v35 }
 0xa25   : > { %v2162_v63 = vmul.f32 %v2762_v47, %v3583_v29  ;;  %v2163_v30 = vmul.f32 %v2762_v47, %v3577_v50  ;;  %v2764_v33 = vpop.eup %2763  ;;  %v2109_v53 = vpop.xlane.xlu1 %2108 }
 0xa26   : > { %v2206_v13 = vmul.f32 %v2764_v33, %v3496_v62  ;;  %v2207_v46 = vmul.f32 %v2764_v33, %v3500_v6  ;;  %v2766_v50 = vpop.eup %2765  ;;  %2775 = vrcp.f32 %v2109_v53 }
 0xa27   : > { %2300 = vmatpush.xpose.msrb.mxu0 %v2162_v63  ;;  %2570 = vmatpush.xpose.msk.msrb.mxu1 %vm1144_vm3, %v2163_v30  ;;  %v2204_v29 = vmul.f32 %v2766_v50, %v3477_v0  ;;  %v2205_v55 = vmul.f32 %v2766_v50, %v3480_v25  ;;  %v2768_v51 = vpop.eup %2767 }
 0xa28   : > { %v2202_v4 = vmul.f32 %v2768_v51, %v3569_v57  ;;  %v2203_v62 = vmul.f32 %v2768_v51, %v3561_v8  ;;  %v2770_v6 = vpop.eup %2769 }
 0xa29   : > { %v2200_v0 = vmul.f32 %v2770_v6, %v3547_v44  ;;  %v2201_v25 = vmul.f32 %v2770_v6, %v3541_v11  ;;  %v2772_v3 = vpop.eup %2771 }
 0xa2a   : > { %2301 = vmatmul.f32.vlgmr.msrb.gmra.mxu0 %v1458_v14  ;;  %2571 = vmatmul.msk.f32.vlgmr.msrb.gmra.mxu1 %vm1144_vm3, %v1478_v20  ;;  %v2198_v48 = vmul.f32 %v2772_v3, %v3516_v5  ;;  %v2199_v57 = vmul.f32 %v2772_v3, %v3510_v42  ;;  %v2774_v8 = vpop.eup %2773 }
 0xa2b   : > { %2333 = vmatpush.xpose.msra.mxu0 %v2208_v32  ;;  %2572 = vmatpush.xpose.msk.msra.mxu1 %vm1144_vm3, %v2209_v43  ;;  %v2196_v12 = vmul.f32 %v2774_v8, %v3565_v40  ;;  %v2197_v31 = vmul.f32 %v2774_v8, %v3559_v21 }
 0xa2c   : > { %v2776_v44 = vpop.eup %2775 }
 0xa2d   : > { %v2195_v11 = vmul.f32 %v2776_v44, %v3594_v19  ;;  %v2194_v60 = vmul.f32 %v2776_v44, %v3599_v17 }
 0xa2f   : > { %2334 = vmatpush.xpose.msra.mxu0 %v2206_v13  ;;  %2573 = vmatpush.xpose.msk.msra.mxu1 %vm1144_vm3, %v2207_v46 }
 0xa33   : > { %2335 = vmatpush.xpose.msra.mxu0 %v2204_v29  ;;  %2574 = vmatpush.xpose.msk.msra.mxu1 %vm1144_vm3, %v2205_v55 }
 0xa37   : > { %2336 = vmatpush.xpose.msra.mxu0 %v2202_v4  ;;  %2575 = vmatpush.xpose.msk.msra.mxu1 %vm1144_vm3, %v2203_v62 }
 0xa3b   : > { %2337 = vmatpush.xpose.msra.mxu0 %v2200_v0  ;;  %2576 = vmatpush.xpose.msk.msra.mxu1 %vm1144_vm3, %v2201_v25 }
 0xa3f   : > { %2338 = vmatpush.xpose.msra.mxu0 %v2198_v48  ;;  %2577 = vmatpush.xpose.msk.msra.mxu1 %vm1144_vm3, %v2199_v57 }
 0xa43   : > { %2339 = vmatpush.xpose.msra.mxu0 %v2196_v12  ;;  %2578 = vmatpush.xpose.msk.msra.mxu1 %vm1144_vm3, %v2197_v31 }
 0xa47   : > { %2340 = vmatpush.xpose.msra.mxu0 %v2194_v60  ;;  %2579 = vmatpush.xpose.msk.msra.mxu1 %vm1144_vm3, %v2195_v11 }
 0xa4a   : > { %2341 = vmatmul.f32.vlgmr.msra.gmra.mxu0 %v1458_v14  ;;  %2580 = vmatmul.msk.f32.vlgmr.msra.gmra.mxu1 %vm1144_vm3, %v1478_v20 }
 0xaa7   : > { %v2302_v42 = vpop.f32.mrf.mxu0  ;;  %v2322_v5 = vpop.f32.mrf.mxu1 }
 0xaa8   : > { %v2323_v26 = vadd.f32 %v2322_v5, %v2302_v42 }
 0xaaa   : > { %v2366_v19 = vmul.f32 %v2365_v27, %v2323_v26 }
 0xac7   : > { %v2342_v40 = vpop.f32.mrf.mxu0  ;;  %v2362_v21 = vpop.f32.mrf.mxu1 }
 0xac8   : > { %v2363_v22 = vadd.f32 %v2362_v21, %v2342_v40 }
 0xaca   : > { %v2367_v41 = vmul.f32 %v2365_v27, %v2363_v22 }
 0xacc   : > { %v2370_v37 = vrot.slane %v2367_v41, 4 }
 0xace   : > { %v2371_v17 = vsel %vm784_vm1, %v2366_v19, %v2370_v37 }
 0xacf   : > { %v2373_v54 = vadd.f32 %v2371_v17, %v3753_v9 }
 0xad1   : > { %2376 = vst.msk [vmem:[#allocation4] sm:$0xff] %vm2375_vm8, %v2373_v54 }
 0xad8   : > { %v2379_v56 = vld [vmem:[#allocation4] sm:$0xf]  ;;  %v2388_v34 = vld [vmem:[#allocation4 + $0x4] sm:$0xf] }
 0xad9   : > { %v2377_v58 = vld [vmem:[#allocation4] sm:$0xf]  ;;  %2381 = vst [vmem:[#allocation1] ss:$2 sm:$0xff] %v2379_v56 }
 0xada   : > { %2582 = vst.msk [vmem:[%s712_s4 + $0x8] sm:$0xf] %vm1292_vm4, %v2388_v34 }
 0xadb   : > { %2378 = vst.msk [vmem:[%s712_s4] sm:$0xf] %vm1292_vm4, %v2377_v58 }
 0xae0   : > { %v2382_v45 = vld.sshfl [vmem:[#allocation1] sm:$0xff pattern:$0x75316420] }
 0xae1   : > { %2383 = vrot.lane.b32.xlu0 %v2382_v45, %s2786_s0 }
 0xb53   : > { %v2384_v23 = vpop.permute.xlu0 %2383 }
 0xb54   : > { %2581 = vst.msk [vmem:[%s712_s4 + $0x4] sm:$0xf] %vm1292_vm4, %v2384_v23 }
 0xb55 PF: > { %s35_s5 = sadd.s32 1, %s2783_s5  }
 0xb56   : > { %p32_p4 = scmp.ge.s32.totalorder %s35_s5, 4  }
 0xb58   :  { %34 = sbr.rel (!%p32_p4) target bundleno = 11 (0xb), region = 144 }

</bundles_post_ra>
